<compile_context>
chip_gen: v5e
topology: v5e:2x2
jax: 0.10.0
libtpu: 0.0.40
codegen_flags: <defaults>
</compile_context>

<pallas_src>
import jax
import jax.numpy as jnp
from jax import lax
from jax.experimental import pallas as pl
from jax.experimental.pallas import tpu as pltpu


def _relu6(x):
    return jnp.minimum(jnp.maximum(x, 0.0), 6.0)


def _round_up(x, m):
    return (x + m - 1) // m * m


def _pick_vmem_limit():
    """Explicit VMEM budget with per-generation headroom."""
    try:
        cap = pltpu.get_tpu_info().vmem_capacity_bytes
    except Exception:
        cap = 128 * 1024 * 1024
    return min(96 * 1024 * 1024, int(cap * 3 // 4))


def _make_kernel(Wp, L, has_expand, use_residual):
    """Kernel over one (channels, flattened-row-tile-canvas) slab.

    Wp = padded canvas width, L = lane-padded flat length of the tile canvas
    ((row_tile + 2) rows * Wp, rounded up to a multiple of 128).
    """
    # Flat-canvas offsets of the 9 depthwise taps: off = (di-1)*Wp + (dj-1).
    offs = tuple((di - 1) * Wp + (dj - 1) for di in range(3) for dj in range(3))

    def _dw_project(x, h, wdw, b2, w3, b3):
        # Depthwise 3x3: 9 lane rolls (XLU) + 9 broadcast MACs (VPU), f32.
        # Valid output positions only ever read in-range canvas entries, so the
        # roll wrap-around never contaminates them (edges are discarded
        # wrapper-side).
        acc = h * wdw[:, 4:5]                         # centre tap (offset 0)
        for k, off in enumerate(offs):
            if off == 0:
                continue
            tap = pltpu.roll(h, shift=(-off) % L, axis=1)
            acc = acc + tap * wdw[:, k:k + 1]
        acc = _relu6(acc + b2)                        # BN bias (scale fused) + ReLU6
        # Project 1x1: bf16 MXU matmul, f32 accumulation, BN bias only.
        y = jnp.dot(w3, acc.astype(jnp.bfloat16),
                    preferred_element_type=jnp.float32) + b3
        if use_residual:
            y = y + x
        return y

    if has_expand:
        def kernel(x_ref, mask_ref, w1_ref, b1_ref, wdw_ref, b2_ref,
                   w3_ref, b3_ref, o_ref):
            x = x_ref[0, 0]                                         # (Cin, L) f32
            # Expand 1x1: bf16 MXU matmul (BN scale pre-fused into w1).
            h = jnp.dot(w1_ref[...], x.astype(jnp.bfloat16),
                        preferred_element_type=jnp.float32)
            # Mask zeroes h on the conv-padding ring; otherwise relu6(b1) would
            # leak into the depthwise conv's zero padding.
            h = _relu6(h + b1_ref[...]) * mask_ref[0]
            o_ref[0, 0] = _dw_project(x, h, wdw_ref[...], b2_ref[...],
                                      w3_ref[...], b3_ref[...])
    else:
        def kernel(x_ref, wdw_ref, b2_ref, w3_ref, b3_ref, o_ref):
            x = x_ref[0, 0]                                         # (Cin, L) f32
            o_ref[0, 0] = _dw_project(x, x, wdw_ref[...], b2_ref[...],
                                      w3_ref[...], b3_ref[...])
    return kernel


def inverted_residual_pallas(x_nchw, params, *, inp, oup, stride, expand_ratio,
                             row_tile=8):
    """Forward pass of InvertedResidual.  NCHW in, NCHW out (like torch)."""
    hidden = int(round(inp * expand_ratio))
    has_expand = expand_ratio != 1
    use_residual = inp == oup            # torch module ignores stride here
    p = stride                           # torch passes `stride` as dw-conv padding

    N, C, H, W = x_nchw.shape
    assert C == inp
    if not has_expand:
        assert hidden == inp

    Hp, Wp = H + 2 * p, W + 2 * p        # zero-padded canvas (= dw conv padding)
    Ho, Wo = Hp - 2, Wp - 2              # dw conv output (k=3, conv-stride=1)
    if use_residual and (Ho, Wo) != (H, W):
        raise ValueError("residual add requires stride == 1 (same as torch)")

    tr = max(1, min(row_tile, Ho))       # output rows per grid step
    R = -(-Ho // tr)                     # number of row tiles
    extra = R * tr - Ho                  # bottom zero rows so tiles divide evenly
    Hc = R * tr + 2                      # canvas rows incl. rounding
    L_raw = (tr + 2) * Wp                # flat tile canvas (rows incl. 1-row halo)
    L = _round_up(L_raw, 128)            # lane-dense minor dim

    x = x_nchw.astype(jnp.float32)
    # Zero-pad the spatial canvas: this IS the depthwise conv's padding.
    xc = jnp.pad(x, ((0, 0), (0, 0), (p, p + extra), (p, p)))        # (N,C,Hc,Wp)
    # Overlapping row tiles (1-row halo top & bottom), flattened + lane-padded.
    x_tiles = jnp.stack(
        [xc[:, :, r * tr: r * tr + tr + 2, :] for r in range(R)], axis=1)
    x_tiles = x_tiles.reshape(N, R, C, L_raw)
    x_tiles = jnp.pad(x_tiles, ((0, 0), (0, 0), (0, 0), (0, L - L_raw)))

    if has_expand:
        # Per-tile interior mask: 1 inside the original HxW image, 0 on padding.
        row_in = (jnp.arange(Hc) >= p) & (jnp.arange(Hc) < p + H)
        col_in = (jnp.arange(Wp) >= p) & (jnp.arange(Wp) < p + W)
        canvas_mask = (row_in[:, None] & col_in[None, :]).astype(jnp.float32)
        mask_tiles = jnp.stack(
            [canvas_mask[r * tr: r * tr + tr + 2] for r in range(R)], axis=0)
        mask_tiles = mask_tiles.reshape(R, L_raw)
        mask_tiles = jnp.pad(mask_tiles, ((0, 0), (0, L - L_raw))).reshape(R, 1, L)
        # Fuse BN scale into expand weights; bf16 for the MXU.
        w1 = (params["w1"] * params["s1"][:, None]).astype(jnp.bfloat16)  # (Chid,Cin)
        b1 = params["b1"].reshape(hidden, 1).astype(jnp.float32)

    # Fuse BN scales into dw / project weights (one-time host-side prep).
    wdw = (jnp.transpose(params["wdw"], (2, 0, 1))
           * params["s2"][:, None, None]).reshape(hidden, 9).astype(jnp.float32)
    b2 = params["b2"].reshape(hidden, 1).astype(jnp.float32)
    w3 = (params["w3"] * params["s3"][:, None]).astype(jnp.bfloat16)      # (Cout,Chid)
    b3 = params["b3"].reshape(oup, 1).astype(jnp.float32)

    kernel = _make_kernel(Wp, L, has_expand, use_residual)

    def run(single_buffer_weights):
        def const_spec(shape):
            # Grid-invariant blocks (weights / biases): fetched once; single
            # buffering reclaims the second pipeline buffer's VMEM.
            if single_buffer_weights:
                return pl.BlockSpec(shape, lambda n, r: (0,) * len(shape),
                                    pipeline_mode=pl.Buffered(1))
            return pl.BlockSpec(shape, lambda n, r: (0,) * len(shape))

        in_specs = [pl.BlockSpec((1, 1, inp, L), lambda n, r: (n, r, 0, 0))]
        args = [x_tiles]
        if has_expand:
            in_specs += [pl.BlockSpec((1, 1, L), lambda n, r: (r, 0, 0)),
                         const_spec((hidden, inp)), const_spec((hidden, 1))]
            args += [mask_tiles, w1, b1]
        in_specs += [const_spec((hidden, 9)), const_spec((hidden, 1)),
                     const_spec((oup, hidden)), const_spec((oup, 1))]
        args += [wdw, b2, w3, b3]

        out = pl.pallas_call(
            kernel,
            out_shape=jax.ShapeDtypeStruct((N, R, oup, L), jnp.float32),
            grid=(N, R),
            in_specs=in_specs,
            out_specs=pl.BlockSpec((1, 1, oup, L), lambda n, r: (n, r, 0, 0)),
            compiler_params=pltpu.CompilerParams(
                dimension_semantics=("parallel", "parallel"),
                vmem_limit_bytes=_pick_vmem_limit(),
            ),
        )(*args)
        return jax.block_until_ready(out)

    try:
        out = run(single_buffer_weights=True)
    except Exception:
        # pipeline_mode / pl.Buffered(1) unsupported on this jax build: fall
        # back to default (double-buffered) specs — functionally identical.
        out = run(single_buffer_weights=False)

    # Reassemble: per-tile slab -> valid rows 1..tr, valid cols 1..Wo -> NCHW.
    y = out[..., :L_raw].reshape(N, R, oup, tr + 2, Wp)
    y = y[:, :, :, 1:1 + tr, 1:1 + Wo]                       # (N, R, Cout, tr, Wo)
    y = jnp.moveaxis(y, 1, 2).reshape(N, oup, R * tr, Wo)[:, :, :Ho, :]
    return y


def init_params(key, inp, oup, expand_ratio, eps=1e-5):
    """Deterministic synthetic weights; BatchNorms folded to (scale, bias)."""
    hidden = int(round(inp * expand_ratio))
    ks = jax.random.split(key, 15)

    def bn_fold(kg, kb, km, kv, c):
        gamma = 1.0 + 0.1 * jax.random.normal(kg, (c,), jnp.float32)
        beta = 0.1 * jax.random.normal(kb, (c,), jnp.float32)
        mean = 0.1 * jax.random.normal(km, (c,), jnp.float32)
        var = jax.nn.softplus(jax.random.normal(kv, (c,), jnp.float32)) + 0.5
        scale = gamma / jnp.sqrt(var + eps)
        bias = beta - mean * scale
        return scale, bias

    w1 = 0.2 * jax.random.normal(ks[0], (hidden, inp), jnp.float32)    # 1x1 expand (OI)
    wdw = 0.2 * jax.random.normal(ks[1], (3, 3, hidden), jnp.float32)  # depthwise 3x3
    w3 = 0.2 * jax.random.normal(ks[2], (oup, hidden), jnp.float32)    # 1x1 project (OI)
    s1, b1 = bn_fold(ks[3], ks[4], ks[5], ks[6], hidden)
    s2, b2 = bn_fold(ks[7], ks[8], ks[9], ks[10], hidden)
    s3, b3 = bn_fold(ks[11], ks[12], ks[13], ks[14], oup)
    return dict(w1=w1, s1=s1, b1=b1, wdw=wdw, s2=s2, b2=b2, w3=w3, s3=s3, b3=b3)


def reference_nchw(x, prm, *, stride, expand_ratio, use_residual):
    """Pure-JAX/XLA reference with identical semantics (f32, HIGHEST precision)."""
    dn = ("NCHW", "OIHW", "NCHW")
    pad = stride
    has_expand = expand_ratio != 1
    h = x
    if has_expand:
        h = lax.conv_general_dilated(h, prm["w1"][:, :, None, None], (1, 1), "VALID",
                                     dimension_numbers=dn,
                                     precision=lax.Precision.HIGHEST)
        h = _relu6(h * prm["s1"][None, :, None, None] + prm["b1"][None, :, None, None])
    chid = h.shape[1]
    wdw = jnp.transpose(prm["wdw"], (2, 0, 1))[:, None, :, :]          # (Chid,1,3,3)
    h = lax.conv_general_dilated(h, wdw, (1, 1), ((pad, pad), (pad, pad)),
                                 dimension_numbers=dn, feature_group_count=chid,
                                 precision=lax.Precision.HIGHEST)
    h = _relu6(h * prm["s2"][None, :, None, None] + prm["b2"][None, :, None, None])
    h = lax.conv_general_dilated(h, prm["w3"][:, :, None, None], (1, 1), "VALID",
                                 dimension_numbers=dn,
                                 precision=lax.Precision.HIGHEST)
    h = h * prm["s3"][None, :, None, None] + prm["b3"][None, :, None, None]
    if use_residual:
        h = h + x
    return h


if __name__ == "__main__":
    key = jax.random.PRNGKey(0)

    configs = [
        # (inp, oup, stride, expand_ratio, N, H, W)
        (8, 8, 1, 4, 2, 16, 16),     # expand + residual path
        (8, 16, 2, 1, 2, 16, 16),    # no-expand path, padding (=stride) 2
    ]
    for cfg in configs:
        inp, oup, stride, expand_ratio, N, H, W = cfg
        kx, kp, key = jax.random.split(key, 3)
        x = jax.random.normal(kx, (N, inp, H, W), jnp.float32)   # NCHW like torch
        params = init_params(kp, inp, oup, expand_ratio)

        out = inverted_residual_pallas(x, params, inp=inp, oup=oup, stride=stride,
                                       expand_ratio=expand_ratio, row_tile=8)
        out = jax.block_until_ready(out)

        ref = reference_nchw(x, params, stride=stride, expand_ratio=expand_ratio,
                             use_residual=(inp == oup))
        assert out.shape == ref.shape, (cfg, out.shape, ref.shape)
        err = float(jnp.max(jnp.abs(out - ref)))
        # Kernel matmuls run in bf16 on the MXU (per perf review); reference is
        # full f32, so compare with a correspondingly relaxed tolerance.
        if not jnp.allclose(out, ref, atol=5e-2, rtol=5e-2):
            raise AssertionError(f"mismatch for config {cfg}: max abs err {err}")

    print("KERNEL_OK")
</pallas_src>

<mosaic_0001>
module attributes {stable_mosaic.version = 11 : i64} {
  func.func @kernel(%arg0: i32, %arg1: i32, %arg2: memref<1x1x8x256xf32, #tpu.memory_space<vmem>>, %arg3: memref<1x1x256xf32, #tpu.memory_space<vmem>>, %arg4: memref<32x8xbf16, #tpu.memory_space<vmem>>, %arg5: memref<32x1xf32, #tpu.memory_space<vmem>>, %arg6: memref<32x9xf32, #tpu.memory_space<vmem>>, %arg7: memref<32x1xf32, #tpu.memory_space<vmem>>, %arg8: memref<8x32xbf16, #tpu.memory_space<vmem>>, %arg9: memref<8x1xf32, #tpu.memory_space<vmem>>, %arg10: memref<1x1x8x256xf32, #tpu.memory_space<vmem>>) attributes {dimension_semantics = [#tpu.dimension_semantics<parallel>, #tpu.dimension_semantics<parallel>], iteration_bounds = array<i64: 2, 2>, scalar_prefetch = 0 : i64, scratch_operands = 0 : i64, tpu.core_type = #tpu.core_type<tc>, window_params = [{transform_indices = @transform_0, window_bounds = array<i64: 1, 1, 8, 256>}, {transform_indices = @transform_1, window_bounds = array<i64: 1, 1, 256>}, {pipeline_mode = #tpu.pipeline_mode<synchronous>, transform_indices = @transform_2, window_bounds = array<i64: 32, 8>}, {pipeline_mode = #tpu.pipeline_mode<synchronous>, transform_indices = @transform_3, window_bounds = array<i64: 32, 1>}, {pipeline_mode = #tpu.pipeline_mode<synchronous>, transform_indices = @transform_4, window_bounds = array<i64: 32, 9>}, {pipeline_mode = #tpu.pipeline_mode<synchronous>, transform_indices = @transform_5, window_bounds = array<i64: 32, 1>}, {pipeline_mode = #tpu.pipeline_mode<synchronous>, transform_indices = @transform_6, window_bounds = array<i64: 8, 32>}, {pipeline_mode = #tpu.pipeline_mode<synchronous>, transform_indices = @transform_7, window_bounds = array<i64: 8, 1>}, {transform_indices = @transform_8, window_bounds = array<i64: 1, 1, 8, 256>}]} {
    %c0 = arith.constant 0 : index
    %c0_0 = arith.constant 0 : index
    %c0_1 = arith.constant 0 : index
    %c0_2 = arith.constant 0 : index
    %0 = vector.load %arg2[%c0, %c0_0, %c0_1, %c0_2] : memref<1x1x8x256xf32, #tpu.memory_space<vmem>>, vector<1x1x8x256xf32>
    %1 = vector.shape_cast %0 : vector<1x1x8x256xf32> to vector<8x256xf32>
    %c0_3 = arith.constant 0 : index
    %c0_4 = arith.constant 0 : index
    %2 = vector.load %arg4[%c0_3, %c0_4] : memref<32x8xbf16, #tpu.memory_space<vmem>>, vector<32x8xbf16>
    %3 = arith.truncf %1 : vector<8x256xf32> to vector<8x256xbf16>
    %cst = arith.constant dense<0.000000e+00> : vector<32x256xf32>
    %4 = tpu.matmul %2, %3, %cst {dimension_numbers = #tpu.dot_dimension_numbers<[1], [0], [0], [1], [0, 0, 1, 1], [], []>} : vector<32x8xbf16>, vector<8x256xbf16>, vector<32x256xf32> -> vector<32x256xf32>
    %c0_5 = arith.constant 0 : index
    %c0_6 = arith.constant 0 : index
    %5 = vector.load %arg5[%c0_5, %c0_6] : memref<32x1xf32, #tpu.memory_space<vmem>>, vector<32x1xf32>
    %6 = vector.broadcast %5 : vector<32x1xf32> to vector<32x256xf32>
    %7 = arith.addf %4, %6 : vector<32x256xf32>
    %cst_7 = arith.constant 0.000000e+00 : f32
    %8 = vector.broadcast %cst_7 : f32 to vector<32x256xf32>
    %9 = arith.maximumf %7, %8 : vector<32x256xf32>
    %cst_8 = arith.constant 6.000000e+00 : f32
    %10 = vector.broadcast %cst_8 : f32 to vector<32x256xf32>
    %11 = arith.minimumf %9, %10 : vector<32x256xf32>
    %c0_9 = arith.constant 0 : index
    %c0_10 = arith.constant 0 : index
    %c0_11 = arith.constant 0 : index
    %12 = vector.load %arg3[%c0_9, %c0_10, %c0_11] : memref<1x1x256xf32, #tpu.memory_space<vmem>>, vector<1x1x256xf32>
    %13 = vector.shape_cast %12 : vector<1x1x256xf32> to vector<1x256xf32>
    %14 = vector.broadcast %13 : vector<1x256xf32> to vector<32x256xf32>
    %15 = arith.mulf %11, %14 : vector<32x256xf32>
    %c0_12 = arith.constant 0 : index
    %c0_13 = arith.constant 0 : index
    %16 = vector.load %arg6[%c0_12, %c0_13] : memref<32x9xf32, #tpu.memory_space<vmem>>, vector<32x9xf32>
    %c0_14 = arith.constant 0 : index
    %c0_15 = arith.constant 0 : index
    %17 = vector.load %arg7[%c0_14, %c0_15] : memref<32x1xf32, #tpu.memory_space<vmem>>, vector<32x1xf32>
    %c0_16 = arith.constant 0 : index
    %c0_17 = arith.constant 0 : index
    %18 = vector.load %arg8[%c0_16, %c0_17] : memref<8x32xbf16, #tpu.memory_space<vmem>>, vector<8x32xbf16>
    %c0_18 = arith.constant 0 : index
    %c0_19 = arith.constant 0 : index
    %19 = vector.load %arg9[%c0_18, %c0_19] : memref<8x1xf32, #tpu.memory_space<vmem>>, vector<8x1xf32>
    %20 = vector.extract_strided_slice %16 {offsets = [0, 4], sizes = [32, 1], strides = [1, 1]} : vector<32x9xf32> to vector<32x1xf32>
    %21 = vector.broadcast %20 : vector<32x1xf32> to vector<32x256xf32>
    %22 = arith.mulf %15, %21 : vector<32x256xf32>
    %c19_i32 = arith.constant 19 : i32
    %23 = tpu.dynamic_rotate %15 by %c19_i32 dim 1 : vector<32x256xf32>, i32 -> vector<32x256xf32>
    %24 = vector.extract_strided_slice %16 {offsets = [0, 0], sizes = [32, 1], strides = [1, 1]} : vector<32x9xf32> to vector<32x1xf32>
    %25 = vector.broadcast %24 : vector<32x1xf32> to vector<32x256xf32>
    %26 = arith.mulf %23, %25 : vector<32x256xf32>
    %27 = arith.addf %22, %26 : vector<32x256xf32>
    %c18_i32 = arith.constant 18 : i32
    %28 = tpu.dynamic_rotate %15 by %c18_i32 dim 1 : vector<32x256xf32>, i32 -> vector<32x256xf32>
    %29 = vector.extract_strided_slice %16 {offsets = [0, 1], sizes = [32, 1], strides = [1, 1]} : vector<32x9xf32> to vector<32x1xf32>
    %30 = vector.broadcast %29 : vector<32x1xf32> to vector<32x256xf32>
    %31 = arith.mulf %28, %30 : vector<32x256xf32>
    %32 = arith.addf %27, %31 : vector<32x256xf32>
    %c17_i32 = arith.constant 17 : i32
    %33 = tpu.dynamic_rotate %15 by %c17_i32 dim 1 : vector<32x256xf32>, i32 -> vector<32x256xf32>
    %34 = vector.extract_strided_slice %16 {offsets = [0, 2], sizes = [32, 1], strides = [1, 1]} : vector<32x9xf32> to vector<32x1xf32>
    %35 = vector.broadcast %34 : vector<32x1xf32> to vector<32x256xf32>
    %36 = arith.mulf %33, %35 : vector<32x256xf32>
    %37 = arith.addf %32, %36 : vector<32x256xf32>
    %c1_i32 = arith.constant 1 : i32
    %38 = tpu.dynamic_rotate %15 by %c1_i32 dim 1 : vector<32x256xf32>, i32 -> vector<32x256xf32>
    %39 = vector.extract_strided_slice %16 {offsets = [0, 3], sizes = [32, 1], strides = [1, 1]} : vector<32x9xf32> to vector<32x1xf32>
    %40 = vector.broadcast %39 : vector<32x1xf32> to vector<32x256xf32>
    %41 = arith.mulf %38, %40 : vector<32x256xf32>
    %42 = arith.addf %37, %41 : vector<32x256xf32>
    %c255_i32 = arith.constant 255 : i32
    %43 = tpu.dynamic_rotate %15 by %c255_i32 dim 1 : vector<32x256xf32>, i32 -> vector<32x256xf32>
    %44 = vector.extract_strided_slice %16 {offsets = [0, 5], sizes = [32, 1], strides = [1, 1]} : vector<32x9xf32> to vector<32x1xf32>
    %45 = vector.broadcast %44 : vector<32x1xf32> to vector<32x256xf32>
    %46 = arith.mulf %43, %45 : vector<32x256xf32>
    %47 = arith.addf %42, %46 : vector<32x256xf32>
    %c239_i32 = arith.constant 239 : i32
    %48 = tpu.dynamic_rotate %15 by %c239_i32 dim 1 : vector<32x256xf32>, i32 -> vector<32x256xf32>
    %49 = vector.extract_strided_slice %16 {offsets = [0, 6], sizes = [32, 1], strides = [1, 1]} : vector<32x9xf32> to vector<32x1xf32>
    %50 = vector.broadcast %49 : vector<32x1xf32> to vector<32x256xf32>
    %51 = arith.mulf %48, %50 : vector<32x256xf32>
    %52 = arith.addf %47, %51 : vector<32x256xf32>
    %c238_i32 = arith.constant 238 : i32
    %53 = tpu.dynamic_rotate %15 by %c238_i32 dim 1 : vector<32x256xf32>, i32 -> vector<32x256xf32>
    %54 = vector.extract_strided_slice %16 {offsets = [0, 7], sizes = [32, 1], strides = [1, 1]} : vector<32x9xf32> to vector<32x1xf32>
    %55 = vector.broadcast %54 : vector<32x1xf32> to vector<32x256xf32>
    %56 = arith.mulf %53, %55 : vector<32x256xf32>
    %57 = arith.addf %52, %56 : vector<32x256xf32>
    %c237_i32 = arith.constant 237 : i32
    %58 = tpu.dynamic_rotate %15 by %c237_i32 dim 1 : vector<32x256xf32>, i32 -> vector<32x256xf32>
    %59 = vector.extract_strided_slice %16 {offsets = [0, 8], sizes = [32, 1], strides = [1, 1]} : vector<32x9xf32> to vector<32x1xf32>
    %60 = vector.broadcast %59 : vector<32x1xf32> to vector<32x256xf32>
    %61 = arith.mulf %58, %60 : vector<32x256xf32>
    %62 = arith.addf %57, %61 : vector<32x256xf32>
    %63 = vector.broadcast %17 : vector<32x1xf32> to vector<32x256xf32>
    %64 = arith.addf %62, %63 : vector<32x256xf32>
    %cst_20 = arith.constant 0.000000e+00 : f32
    %65 = vector.broadcast %cst_20 : f32 to vector<32x256xf32>
    %66 = arith.maximumf %64, %65 : vector<32x256xf32>
    %cst_21 = arith.constant 6.000000e+00 : f32
    %67 = vector.broadcast %cst_21 : f32 to vector<32x256xf32>
    %68 = arith.minimumf %66, %67 : vector<32x256xf32>
    %69 = arith.truncf %68 : vector<32x256xf32> to vector<32x256xbf16>
    %cst_22 = arith.constant dense<0.000000e+00> : vector<8x256xf32>
    %70 = tpu.matmul %18, %69, %cst_22 {dimension_numbers = #tpu.dot_dimension_numbers<[1], [0], [0], [1], [0, 0, 1, 1], [], []>} : vector<8x32xbf16>, vector<32x256xbf16>, vector<8x256xf32> -> vector<8x256xf32>
    %71 = vector.broadcast %19 : vector<8x1xf32> to vector<8x256xf32>
    %72 = arith.addf %70, %71 : vector<8x256xf32>
    %73 = arith.addf %72, %1 : vector<8x256xf32>
    %c0_23 = arith.constant 0 : index
    %c0_24 = arith.constant 0 : index
    %c0_25 = arith.constant 0 : index
    %c0_26 = arith.constant 0 : index
    %74 = vector.load %arg10[%c0_23, %c0_24, %c0_25, %c0_26] : memref<1x1x8x256xf32, #tpu.memory_space<vmem>>, vector<1x1x8x256xf32>
    %75 = vector.shape_cast %74 : vector<1x1x8x256xf32> to vector<8x256xf32>
    %76 = vector.shape_cast %73 : vector<8x256xf32> to vector<1x1x8x256xf32>
    tpu.vector_store %arg10[%c0_23, %c0_24, %c0_25, %c0_26], %76 {strides = array<i32>} : memref<1x1x8x256xf32, #tpu.memory_space<vmem>>, vector<1x1x8x256xf32>,
    return
  }
  func.func @transform_0(%arg0: i32, %arg1: i32) -> (i32, i32, i32, i32) {
    %c0_i32 = arith.constant 0 : i32
    %c0_i32_0 = arith.constant 0 : i32
    %c0_i32_1 = arith.constant 0 : i32
    return %arg0, %arg1, %c0_i32, %c0_i32_0 : i32, i32, i32, i32
  }
  func.func @transform_1(%arg0: i32, %arg1: i32) -> (i32, i32, i32) {
    %c0_i32 = arith.constant 0 : i32
    %c0_i32_0 = arith.constant 0 : i32
    %c0_i32_1 = arith.constant 0 : i32
    return %arg1, %c0_i32, %c0_i32_0 : i32, i32, i32
  }
  func.func @transform_2(%arg0: i32, %arg1: i32) -> (i32, i32) {
    %c0_i32 = arith.constant 0 : i32
    %c0_i32_0 = arith.constant 0 : i32
    %c0_i32_1 = arith.constant 0 : i32
    return %c0_i32, %c0_i32_0 : i32, i32
  }
  func.func @transform_3(%arg0: i32, %arg1: i32) -> (i32, i32) {
    %c0_i32 = arith.constant 0 : i32
    %c0_i32_0 = arith.constant 0 : i32
    %c0_i32_1 = arith.constant 0 : i32
    return %c0_i32, %c0_i32_0 : i32, i32
  }
  func.func @transform_4(%arg0: i32, %arg1: i32) -> (i32, i32) {
    %c0_i32 = arith.constant 0 : i32
    %c0_i32_0 = arith.constant 0 : i32
    %c0_i32_1 = arith.constant 0 : i32
    return %c0_i32, %c0_i32_0 : i32, i32
  }
  func.func @transform_5(%arg0: i32, %arg1: i32) -> (i32, i32) {
    %c0_i32 = arith.constant 0 : i32
    %c0_i32_0 = arith.constant 0 : i32
    %c0_i32_1 = arith.constant 0 : i32
    return %c0_i32, %c0_i32_0 : i32, i32
  }
  func.func @transform_6(%arg0: i32, %arg1: i32) -> (i32, i32) {
    %c0_i32 = arith.constant 0 : i32
    %c0_i32_0 = arith.constant 0 : i32
    %c0_i32_1 = arith.constant 0 : i32
    return %c0_i32, %c0_i32_0 : i32, i32
  }
  func.func @transform_7(%arg0: i32, %arg1: i32) -> (i32, i32) {
    %c0_i32 = arith.constant 0 : i32
    %c0_i32_0 = arith.constant 0 : i32
    %c0_i32_1 = arith.constant 0 : i32
    return %c0_i32, %c0_i32_0 : i32, i32
  }
  func.func @transform_8(%arg0: i32, %arg1: i32) -> (i32, i32, i32, i32) {
    %c0_i32 = arith.constant 0 : i32
    %c0_i32_0 = arith.constant 0 : i32
    %c0_i32_1 = arith.constant 0 : i32
    return %arg0, %arg1, %c0_i32, %c0_i32_0 : i32, i32, i32, i32
  }
}

module attributes {stable_mosaic.version = 11 : i64} {
  func.func @kernel(%arg0: i32, %arg1: i32, %arg2: memref<1x1x8x256xf32, #tpu.memory_space<vmem>>, %arg3: memref<1x1x256xf32, #tpu.memory_space<vmem>>, %arg4: memref<32x8xbf16, #tpu.memory_space<vmem>>, %arg5: memref<32x1xf32, #tpu.memory_space<vmem>>, %arg6: memref<32x9xf32, #tpu.memory_space<vmem>>, %arg7: memref<32x1xf32, #tpu.memory_space<vmem>>, %arg8: memref<8x32xbf16, #tpu.memory_space<vmem>>, %arg9: memref<8x1xf32, #tpu.memory_space<vmem>>, %arg10: memref<1x1x8x256xf32, #tpu.memory_space<vmem>>) attributes {dimension_semantics = [#tpu.dimension_semantics<parallel>, #tpu.dimension_semantics<parallel>], iteration_bounds = array<i64: 2, 2>, scalar_prefetch = 0 : i64, scratch_operands = 0 : i64, tpu.core_type = #tpu.core_type<tc>, window_params = [{transform_indices = @transform_0, window_bounds = array<i64: 1, 1, 8, 256>}, {transform_indices = @transform_1, window_bounds = array<i64: 1, 1, 256>}, {pipeline_mode = #tpu.pipeline_mode<synchronous>, transform_indices = @transform_2, window_bounds = array<i64: 32, 8>}, {pipeline_mode = #tpu.pipeline_mode<synchronous>, transform_indices = @transform_3, window_bounds = array<i64: 32, 1>}, {pipeline_mode = #tpu.pipeline_mode<synchronous>, transform_indices = @transform_4, window_bounds = array<i64: 32, 9>}, {pipeline_mode = #tpu.pipeline_mode<synchronous>, transform_indices = @transform_5, window_bounds = array<i64: 32, 1>}, {pipeline_mode = #tpu.pipeline_mode<synchronous>, transform_indices = @transform_6, window_bounds = array<i64: 8, 32>}, {pipeline_mode = #tpu.pipeline_mode<synchronous>, transform_indices = @transform_7, window_bounds = array<i64: 8, 1>}, {transform_indices = @transform_8, window_bounds = array<i64: 1, 1, 8, 256>}]} {
    %c0 = arith.constant 0 : index
    %c0_0 = arith.constant 0 : index
    %c0_1 = arith.constant 0 : index
    %c0_2 = arith.constant 0 : index
    %0 = vector.load %arg2[%c0, %c0_0, %c0_1, %c0_2] : memref<1x1x8x256xf32, #tpu.memory_space<vmem>>, vector<1x1x8x256xf32>
    %1 = vector.shape_cast %0 : vector<1x1x8x256xf32> to vector<8x256xf32>
    %c0_3 = arith.constant 0 : index
    %c0_4 = arith.constant 0 : index
    %2 = vector.load %arg4[%c0_3, %c0_4] : memref<32x8xbf16, #tpu.memory_space<vmem>>, vector<32x8xbf16>
    %3 = arith.truncf %1 : vector<8x256xf32> to vector<8x256xbf16>
    %cst = arith.constant dense<0.000000e+00> : vector<32x256xf32>
    %4 = tpu.matmul %2, %3, %cst {dimension_numbers = #tpu.dot_dimension_numbers<[1], [0], [0], [1], [0, 0, 1, 1], [], []>} : vector<32x8xbf16>, vector<8x256xbf16>, vector<32x256xf32> -> vector<32x256xf32>
    %c0_5 = arith.constant 0 : index
    %c0_6 = arith.constant 0 : index
    %5 = vector.load %arg5[%c0_5, %c0_6] : memref<32x1xf32, #tpu.memory_space<vmem>>, vector<32x1xf32>
    %6 = vector.broadcast %5 : vector<32x1xf32> to vector<32x256xf32>
    %7 = arith.addf %4, %6 : vector<32x256xf32>
    %cst_7 = arith.constant 0.000000e+00 : f32
    %8 = vector.broadcast %cst_7 : f32 to vector<32x256xf32>
    %9 = arith.maximumf %7, %8 : vector<32x256xf32>
    %cst_8 = arith.constant 6.000000e+00 : f32
    %10 = vector.broadcast %cst_8 : f32 to vector<32x256xf32>
    %11 = arith.minimumf %9, %10 : vector<32x256xf32>
    %c0_9 = arith.constant 0 : index
    %c0_10 = arith.constant 0 : index
    %c0_11 = arith.constant 0 : index
    %12 = vector.load %arg3[%c0_9, %c0_10, %c0_11] : memref<1x1x256xf32, #tpu.memory_space<vmem>>, vector<1x1x256xf32>
    %13 = vector.shape_cast %12 : vector<1x1x256xf32> to vector<1x256xf32>
    %14 = vector.broadcast %13 : vector<1x256xf32> to vector<32x256xf32>
    %15 = arith.mulf %11, %14 : vector<32x256xf32>
    %c0_12 = arith.constant 0 : index
    %c0_13 = arith.constant 0 : index
    %16 = vector.load %arg6[%c0_12, %c0_13] : memref<32x9xf32, #tpu.memory_space<vmem>>, vector<32x9xf32>
    %c0_14 = arith.constant 0 : index
    %c0_15 = arith.constant 0 : index
    %17 = vector.load %arg7[%c0_14, %c0_15] : memref<32x1xf32, #tpu.memory_space<vmem>>, vector<32x1xf32>
    %c0_16 = arith.constant 0 : index
    %c0_17 = arith.constant 0 : index
    %18 = vector.load %arg8[%c0_16, %c0_17] : memref<8x32xbf16, #tpu.memory_space<vmem>>, vector<8x32xbf16>
    %c0_18 = arith.constant 0 : index
    %c0_19 = arith.constant 0 : index
    %19 = vector.load %arg9[%c0_18, %c0_19] : memref<8x1xf32, #tpu.memory_space<vmem>>, vector<8x1xf32>
    %20 = vector.extract_strided_slice %16 {offsets = [0, 4], sizes = [32, 1], strides = [1, 1]} : vector<32x9xf32> to vector<32x1xf32>
    %21 = vector.broadcast %20 : vector<32x1xf32> to vector<32x256xf32>
    %22 = arith.mulf %15, %21 : vector<32x256xf32>
    %c19_i32 = arith.constant 19 : i32
    %23 = tpu.dynamic_rotate %15 by %c19_i32 dim 1 : vector<32x256xf32>, i32 -> vector<32x256xf32>
    %24 = vector.extract_strided_slice %16 {offsets = [0, 0], sizes = [32, 1], strides = [1, 1]} : vector<32x9xf32> to vector<32x1xf32>
    %25 = vector.broadcast %24 : vector<32x1xf32> to vector<32x256xf32>
    %26 = arith.mulf %23, %25 : vector<32x256xf32>
    %27 = arith.addf %22, %26 : vector<32x256xf32>
    %c18_i32 = arith.constant 18 : i32
    %28 = tpu.dynamic_rotate %15 by %c18_i32 dim 1 : vector<32x256xf32>, i32 -> vector<32x256xf32>
    %29 = vector.extract_strided_slice %16 {offsets = [0, 1], sizes = [32, 1], strides = [1, 1]} : vector<32x9xf32> to vector<32x1xf32>
    %30 = vector.broadcast %29 : vector<32x1xf32> to vector<32x256xf32>
    %31 = arith.mulf %28, %30 : vector<32x256xf32>
    %32 = arith.addf %27, %31 : vector<32x256xf32>
    %c17_i32 = arith.constant 17 : i32
    %33 = tpu.dynamic_rotate %15 by %c17_i32 dim 1 : vector<32x256xf32>, i32 -> vector<32x256xf32>
    %34 = vector.extract_strided_slice %16 {offsets = [0, 2], sizes = [32, 1], strides = [1, 1]} : vector<32x9xf32> to vector<32x1xf32>
    %35 = vector.broadcast %34 : vector<32x1xf32> to vector<32x256xf32>
    %36 = arith.mulf %33, %35 : vector<32x256xf32>
    %37 = arith.addf %32, %36 : vector<32x256xf32>
    %c1_i32 = arith.constant 1 : i32
    %38 = tpu.dynamic_rotate %15 by %c1_i32 dim 1 : vector<32x256xf32>, i32 -> vector<32x256xf32>
    %39 = vector.extract_strided_slice %16 {offsets = [0, 3], sizes = [32, 1], strides = [1, 1]} : vector<32x9xf32> to vector<32x1xf32>
    %40 = vector.broadcast %39 : vector<32x1xf32> to vector<32x256xf32>
    %41 = arith.mulf %38, %40 : vector<32x256xf32>
    %42 = arith.addf %37, %41 : vector<32x256xf32>
    %c255_i32 = arith.constant 255 : i32
    %43 = tpu.dynamic_rotate %15 by %c255_i32 dim 1 : vector<32x256xf32>, i32 -> vector<32x256xf32>
    %44 = vector.extract_strided_slice %16 {offsets = [0, 5], sizes = [32, 1], strides = [1, 1]} : vector<32x9xf32> to vector<32x1xf32>
    %45 = vector.broadcast %44 : vector<32x1xf32> to vector<32x256xf32>
    %46 = arith.mulf %43, %45 : vector<32x256xf32>
    %47 = arith.addf %42, %46 : vector<32x256xf32>
    %c239_i32 = arith.constant 239 : i32
    %48 = tpu.dynamic_rotate %15 by %c239_i32 dim 1 : vector<32x256xf32>, i32 -> vector<32x256xf32>
    %49 = vector.extract_strided_slice %16 {offsets = [0, 6], sizes = [32, 1], strides = [1, 1]} : vector<32x9xf32> to vector<32x1xf32>
    %50 = vector.broadcast %49 : vector<32x1xf32> to vector<32x256xf32>
    %51 = arith.mulf %48, %50 : vector<32x256xf32>
    %52 = arith.addf %47, %51 : vector<32x256xf32>
    %c238_i32 = arith.constant 238 : i32
    %53 = tpu.dynamic_rotate %15 by %c238_i32 dim 1 : vector<32x256xf32>, i32 -> vector<32x256xf32>
    %54 = vector.extract_strided_slice %16 {offsets = [0, 7], sizes = [32, 1], strides = [1, 1]} : vector<32x9xf32> to vector<32x1xf32>
    %55 = vector.broadcast %54 : vector<32x1xf32> to vector<32x256xf32>
    %56 = arith.mulf %53, %55 : vector<32x256xf32>
    %57 = arith.addf %52, %56 : vector<32x256xf32>
    %c237_i32 = arith.constant 237 : i32
    %58 = tpu.dynamic_rotate %15 by %c237_i32 dim 1 : vector<32x256xf32>, i32 -> vector<32x256xf32>
    %59 = vector.extract_strided_slice %16 {offsets = [0, 8], sizes = [32, 1], strides = [1, 1]} : vector<32x9xf32> to vector<32x1xf32>
    %60 = vector.broadcast %59 : vector<32x1xf32> to vector<32x256xf32>
    %61 = arith.mulf %58, %60 : vector<32x256xf32>
    %62 = arith.addf %57, %61 : vector<32x256xf32>
    %63 = vector.broadcast %17 : vector<32x1xf32> to vector<32x256xf32>
    %64 = arith.addf %62, %63 : vector<32x256xf32>
    %cst_20 = arith.constant 0.000000e+00 : f32
    %65 = vector.broadcast %cst_20 : f32 to vector<32x256xf32>
    %66 = arith.maximumf %64, %65 : vector<32x256xf32>
    %cst_21 = arith.constant 6.000000e+00 : f32
    %67 = vector.broadcast %cst_21 : f32 to vector<32x256xf32>
    %68 = arith.minimumf %66, %67 : vector<32x256xf32>
    %69 = arith.truncf %68 : vector<32x256xf32> to vector<32x256xbf16>
    %cst_22 = arith.constant dense<0.000000e+00> : vector<8x256xf32>
    %70 = tpu.matmul %18, %69, %cst_22 {dimension_numbers = #tpu.dot_dimension_numbers<[1], [0], [0], [1], [0, 0, 1, 1], [], []>} : vector<8x32xbf16>, vector<32x256xbf16>, vector<8x256xf32> -> vector<8x256xf32>
    %71 = vector.broadcast %19 : vector<8x1xf32> to vector<8x256xf32>
    %72 = arith.addf %70, %71 : vector<8x256xf32>
    %73 = arith.addf %72, %1 : vector<8x256xf32>
    %c0_23 = arith.constant 0 : index
    %c0_24 = arith.constant 0 : index
    %c0_25 = arith.constant 0 : index
    %c0_26 = arith.constant 0 : index
    %74 = vector.load %arg10[%c0_23, %c0_24, %c0_25, %c0_26] : memref<1x1x8x256xf32, #tpu.memory_space<vmem>>, vector<1x1x8x256xf32>
    %75 = vector.shape_cast %74 : vector<1x1x8x256xf32> to vector<8x256xf32>
    %76 = vector.shape_cast %73 : vector<8x256xf32> to vector<1x1x8x256xf32>
    tpu.vector_store %arg10[%c0_23, %c0_24, %c0_25, %c0_26], %76 {strides = array<i32>} : memref<1x1x8x256xf32, #tpu.memory_space<vmem>>, vector<1x1x8x256xf32>,
    return
  }
  func.func @transform_0(%arg0: i32, %arg1: i32) -> (i32, i32, i32, i32) {
    %c0_i32 = arith.constant 0 : i32
    %c0_i32_0 = arith.constant 0 : i32
    %c0_i32_1 = arith.constant 0 : i32
    return %arg0, %arg1, %c0_i32, %c0_i32_0 : i32, i32, i32, i32
  }
  func.func @transform_1(%arg0: i32, %arg1: i32) -> (i32, i32, i32) {
    %c0_i32 = arith.constant 0 : i32
    %c0_i32_0 = arith.constant 0 : i32
    %c0_i32_1 = arith.constant 0 : i32
    return %arg1, %c0_i32, %c0_i32_0 : i32, i32, i32
  }
  func.func @transform_2(%arg0: i32, %arg1: i32) -> (i32, i32) {
    %c0_i32 = arith.constant 0 : i32
    %c0_i32_0 = arith.constant 0 : i32
    %c0_i32_1 = arith.constant 0 : i32
    return %c0_i32, %c0_i32_0 : i32, i32
  }
  func.func @transform_3(%arg0: i32, %arg1: i32) -> (i32, i32) {
    %c0_i32 = arith.constant 0 : i32
    %c0_i32_0 = arith.constant 0 : i32
    %c0_i32_1 = arith.constant 0 : i32
    return %c0_i32, %c0_i32_0 : i32, i32
  }
  func.func @transform_4(%arg0: i32, %arg1: i32) -> (i32, i32) {
    %c0_i32 = arith.constant 0 : i32
    %c0_i32_0 = arith.constant 0 : i32
    %c0_i32_1 = arith.constant 0 : i32
    return %c0_i32, %c0_i32_0 : i32, i32
  }
  func.func @transform_5(%arg0: i32, %arg1: i32) -> (i32, i32) {
    %c0_i32 = arith.constant 0 : i32
    %c0_i32_0 = arith.constant 0 : i32
    %c0_i32_1 = arith.constant 0 : i32
    return %c0_i32, %c0_i32_0 : i32, i32
  }
  func.func @transform_6(%arg0: i32, %arg1: i32) -> (i32, i32) {
    %c0_i32 = arith.constant 0 : i32
    %c0_i32_0 = arith.constant 0 : i32
    %c0_i32_1 = arith.constant 0 : i32
    return %c0_i32, %c0_i32_0 : i32, i32
  }
  func.func @transform_7(%arg0: i32, %arg1: i32) -> (i32, i32) {
    %c0_i32 = arith.constant 0 : i32
    %c0_i32_0 = arith.constant 0 : i32
    %c0_i32_1 = arith.constant 0 : i32
    return %c0_i32, %c0_i32_0 : i32, i32
  }
  func.func @transform_8(%arg0: i32, %arg1: i32) -> (i32, i32, i32, i32) {
    %c0_i32 = arith.constant 0 : i32
    %c0_i32_0 = arith.constant 0 : i32
    %c0_i32_1 = arith.constant 0 : i32
    return %arg0, %arg1, %c0_i32, %c0_i32_0 : i32, i32, i32, i32
  }
}

</mosaic_0001>

<bundles_post_ra>
// kernel: tpu_custom_call.1
= control target key start
LH: loop header
LB: loop body
LE: loop exit
PB: predicated region body
PF: predicated region fallthrough
CT: control target
= control target key end

     0   :  { %s2163_s0 = inlined_call_operand.vmem [shape: f32[2,2,8,256], index: 0, kind: input, shape index: {}]   ;;  %s2164_s1 = inlined_call_operand.vmem [shape: f32[2,1,256], index: 1, kind: input, shape index: {}]   ;;  %s2165_s2 = inlined_call_operand.vmem [shape: bf16[32,8], index: 2, kind: input, shape index: {}]   ;;  %s2166_s3 = inlined_call_operand.vmem [shape: f32[32,1], index: 3, kind: input, shape index: {}]   ;;  %s2167_s4 = inlined_call_operand.vmem [shape: f32[32,9], index: 4, kind: input, shape index: {}]   ;;  %s2168_s5 = inlined_call_operand.vmem [shape: f32[32,1], index: 5, kind: input, shape index: {}]   ;;  %s2169_s6 = inlined_call_operand.vmem [shape: bf16[8,32], index: 6, kind: input, shape index: {}]   ;;  %s2170_s7 = inlined_call_operand.vmem [shape: f32[8,1], index: 7, kind: input, shape index: {}]   ;;  %s2171_s8 = inlined_call_operand.hbm [shape: f32[2,2,8,256], index: 8, kind: output, shape index: {}]  }
   0x1   :  { %2175 = sst [smem:[#allocation8_spill]] %s2163_s0 }
   0x2   :  { %13 = vsyncpa [#allocation3], 0 }
   0x3   :  { %15 = vsyncpa [#allocation3 + $0x1], 0  ;;  %s1483_s27 = smov 0   ;;  %s1485_s28 = smov 0  }
   0x4   :  { %s1487_s29 = smov 0   ;;  %s1489_s30 = smov 0  }
   0x5   :  { %s1491_s9 = smov 0   ;;  %s1493_s10 = smov 0  }
   0x6   :  { %s1495_s11 = smov 0   ;;  %s1497_s12 = smov 0  }
   0x7 LB: > { %2176 = sst [smem:[#allocation5_spill]] %s1415_s11  ;;  %s1170_s13 = sadd.s32 4294967295, %s1419_s12   ;;  %s1419_s12 = sphi %s1497_s12, %s21_s12   ;;  %s1415_s11 = sphi %s1495_s11, %s2184_s11   ;;  %s1411_s10 = sphi %s1493_s10, %s2189_s10   ;;  %s1407_s9 = sphi %s1491_s9, %s2182_s9   ;;  %s1403_s30 = sphi %s1489_s30, %s2188_s30   ;;  %s1399_s29 = sphi %s1487_s29, %s2187_s29   ;;  %s1395_s28 = sphi %s1485_s28, %s2186_s28   ;;  %s1391_s27 = sphi %s1483_s27, %s2185_s27  }
   0x8   : > { %s1171_s14 = sadd.s32 4294967294, %s1419_s12   ;;  %s30_s15 = sadd.s32 1, %s1411_s10 }
   0x9   : > { %p31_p0 = scmp.ge.s32.totalorder %s30_s15, 2  ;;  %s33_s16 = sadd.s32 1, %s1415_s11 }
   0xa   : > { %p232_p1 = scmp.ne.s32.totalorder %s1399_s29, %s1395_s28  ;;  %p233_p2 = scmp.eq.s32.totalorder %s1170_s13, 3 }
   0xb   : > { %s2191_s15 = smov (%p31_p0, %s30_s15), 0  ;;  %s2193_s16 = smov (!%p31_p0, %s33_s16), %s1415_s11 }
   0xc   : > { %2177 = sst [smem:[#allocation6_spill]] %s2191_s15  ;;  %s218_s17 = ssub.s32 %s1411_s10, %s2191_s15 }
   0xd   : > { %p1534_p3 = por %p233_p2, %p232_p1  ;;  %p35_p4 = scmp.ge.s32.totalorder %s2193_s16, 2 }
   0xe   : > { %p238_p5 = scmp.ne.s32.totalorder %s1395_s28, %s1391_s27  ;;  %p239_p6 = scmp.eq.s32.totalorder %s1171_s14, 3 }
   0xf   : > { %p1174_p7 = scmp.ge.s32.totalorder %s1419_s12, 1  ;;  %s2195_s16 = smov (%p35_p4, %s2193_s16), 0 }
  0x10   : > { %2179 = sst [smem:[#allocation7_spill]] %s2195_s16  ;;  %p1543_p8 = por %p239_p6, %p238_p5 }
  0x11   : > { %p294_p9 = scmp.lt.s32.totalorder %s1419_s12, 5  ;;  %s217_s20 = ssub.s32 %s1415_s11, %s2195_s16 }
  0x12   : > { %s222_s21 = sadd.s32 1, %s1399_s29  ;;  %s219_s22 = sor.u32 %s218_s17, %s217_s20 }
  0x13   : > { %p295_p10 = pnand %p1174_p7, %p294_p9  ;;  %p220_p11 = scmp.eq.s32.totalorder %s219_s22, 0 }
  0x14   : > { %p336_p12 = scmp.lt.s32.totalorder (!%p295_p10), %s1407_s9, 1  ;;  %p338_p13 = scmp.lt.s32.totalorder (!%p295_p10), %s1403_s30, 1 }
  0x15   : > { %s1552_s23 = scalar_select %p220_p11, %s1399_s29, %s222_s21  }
  0x16   : > { %298 = sbr.rel (%p295_p10) target bundleno = 681 (0x2a9), region = 52  ;;  %s2181_s0 = sld [smem:[#allocation8_spill]] (!%p295_p10) }
  0x17   : > { %s1428_s11 = smov (!%p295_p10), 18   ;;  %s1429_s13 = smov (!%p295_p10), 1  }
  0x18   : > { %s1430_s14 = smov (!%p295_p10), 127   ;;  %s1432_s17 = smov (!%p295_p10), 111  }
  0x19   : > { %s1195_s15 = sshll.u32 (!%p295_p10), %s1403_s30, 1 }
  0x1b   : > { %v1557_v0 = vld [vmem:[%s2167_s4 + $0x10] sm:$0xff]  ;;  %v1421_v1 = vmov 4   ;;  %v1422_v2 = vmov 0   ;;  %s337_s26 = scalar_select %p336_p12, %s1407_s9, 1  ;;  %v1570_v4 = vld [vmem:[%s2167_s4] sm:$0xff]  ;;  %vm399_vm0 = vcmask 1043456  }
  0x1c   : > { %1292 = vset.pattern.permute.xlu0 %v1421_v1  ;;  %1290 = vset.pattern.permute.xlu1 %v1422_v2  ;;  %v360_v3 = vld [vmem:[%s2166_s3 + $0x10] sm:$0xff]  ;;  %s1573_s21 = scalar_select %p338_p13, %s1403_s30, 1  ;;  %v358_v5 = vld [vmem:[%s2166_s3] sm:$0xff]  ;;  %v361_v8 = vld [vmem:[%s2166_s3 + $0x18] sm:$0xff]  ;;  %vm392_vm1 = vcmask 64512   ;;  %v1423_v18 = vmov 1  }
  0x1d   : > { %496 = vperm.xlu0 %1292, %v1557_v0   ;;  %1291 = vset.pattern.permute.xlu2 %v1421_v1  ;;  %s1177_s22 = sshll.u32 %s337_s26, 2  ;;  %v1596_v11 = vld [vmem:[%s2167_s4 + $0x8] sm:$0xff]  ;;  %v1200_v14 = vld [vmem:[%s2165_s2] sm:$0xff]  ;;  %v1610_v16 = vld [vmem:[%s2167_s4 + $0x18] sm:$0xff]  ;;  %v1424_v19 = vmov 2   ;;  %v1425_v20 = vmov 3  }
  0x1e   : > { %374 = vperm.xlu1 %1290, %v360_v3   ;;  %486 = vperm.xlu2 %1291, %v1570_v4   ;;  %s1176_s24 = sshll.u32 %s1573_s21, 1  ;;  %v359_v15 = vld [vmem:[%s2166_s3 + $0x8] sm:$0xff]  ;;  %s1426_s21 = smov 17   ;;  %vm1023_vm10 = vcmask 261120  }
  0x1f   : > { %s342_s25 = sadd.s32 %s1177_s22, %s1176_s24  ;;  %v1201_v17 = vld [vmem:[%s2165_s2 + $0x8] sm:$0xff]  ;;  %s1434_s26 = smov 110  }
  0x20   : > { %s1178_s16 = sshll.u32 %s342_s25, 3  ;;  %s1435_s22 = smov 109  }
  0x21   : > { %s1585_s20 = scalar_lea.vmem %s2181_s0, %s1178_s16  ;;  %s348_s16 = scalar_lea.vmem %s2164_s1, %s1176_s24 }
  0x22   : > { %v350_v6 = vld [vmem:[%s1585_s20] sm:$0xff]  ;;  %v351_v7 = vld [vmem:[%s1585_s20 + $0x8] sm:$0xff]  ;;  %s1427_s24 = smov 19  }
  0x23   : > { %v356_v9 = vpack.c.bf16 %v350_v6, %v350_v6  ;;  %v357_v10 = vpack.c.bf16 %v351_v7, %v351_v7  ;;  %v460_v23 = vld [vmem:[%s348_s16] sm:$0x3]  ;;  %s1196_s16 = sshll.u32 %s1407_s9, 2 }
  0x24   : > { %v1643_v28 = vperm.slane %v460_v23, 0  ;;  %v1645_v29 = vperm.slane %v460_v23, 1 }
  0x25   : > { %1293 = vset.pattern.permute.xlu0 %v1422_v2  ;;  %v401_v12 = vsel %vm399_vm0, %v356_v9, 0  ;;  %v404_v13 = vsel %vm399_vm0, %v357_v10, 0  ;;  %v1431_v9 = vmov 5  }
  0x26   : > { %364 = vperm.xlu0 %1293, %v358_v5   ;;  %491 = vperm.xlu2 %1291, %v1596_v11  }
  0x27   : > { %379 = vperm.xlu1 %1290, %v361_v8   ;;  %413 = vmatpush.bf16.msra.mxu0 %v401_v12 }
  0x28   : > { %432 = vmatpush.bf16.msra.mxu1 %v404_v13 }
  0x2a   : > { %1188 = vmatmul.msk.bf16.vlgmr.msra.gmra.mxu0 %vm392_vm1, %v1200_v14 }
  0x2b   : > { %1190 = vmatmul.msk.bf16.vlgmr.msra.gmra.mxu1 %vm392_vm1, %v1200_v14 }
  0x2e   : > { %369 = vperm.xlu0 %1293, %v359_v15   ;;  %1295 = vset.pattern.permute.xlu2 %v1422_v2 }
  0x2f   : > { %1294 = vset.pattern.permute.xlu1 %v1421_v1  ;;  %540 = vperm.xlu2 %1295, %v1570_v4  }
  0x30   : > { %501 = vperm.xlu1 %1294, %v1610_v16  }
  0x36   : > { %544 = vperm.xlu0 %1293, %v1596_v11  }
  0x37   : > { %552 = vperm.xlu2 %1295, %v1610_v16  }
  0x38   : > { %1296 = vset.pattern.permute.xlu1 %v1422_v2 }
  0x39   : > { %548 = vperm.xlu1 %1296, %v1557_v0  }
  0x3a   : > { %1189 = vmatmul.msk.bf16.gmra.mxu0 %vm392_vm1, %v1201_v17 }
  0x3b   : > { %1191 = vmatmul.msk.bf16.gmra.mxu1 %vm392_vm1, %v1201_v17 }
  0x3e   : > { %1297 = vset.pattern.permute.xlu0 %v1423_v18 }
  0x3f   : > { %1299 = vset.pattern.permute.xlu2 %v1423_v18  ;;  %597 = vperm.xlu0 %1297, %v1570_v4  }
  0x40   : > { %605 = vperm.xlu2 %1299, %v1557_v0  }
  0x41   : > { %1298 = vset.pattern.permute.xlu1 %v1423_v18 }
  0x42   : > { %601 = vperm.xlu1 %1298, %v1596_v11  }
  0x47   : > { %1302 = vset.pattern.permute.xlu0 %v1424_v19 }
  0x48   : > { %1301 = vset.pattern.permute.xlu2 %v1424_v19  ;;  %662 = vperm.xlu0 %1302, %v1557_v0  }
  0x49   : > { %658 = vperm.xlu2 %1301, %v1596_v11  }
  0x4a   : > { %609 = vperm.xlu1 %1298, %v1610_v16  }
  0x50   : > { %1304 = vset.pattern.permute.xlu0 %v1425_v20 }
  0x51   : > { %1303 = vset.pattern.permute.xlu2 %v1425_v20  ;;  %715 = vperm.xlu0 %1304, %v1596_v11  }
  0x52   : > { %1300 = vset.pattern.permute.xlu1 %v1424_v19  ;;  %711 = vperm.xlu2 %1303, %v1570_v4  }
  0x53   : > { %654 = vperm.xlu1 %1300, %v1570_v4  }
  0x59   : > { %1306 = vset.pattern.permute.xlu0 %v1431_v9 }
  0x5a   : > { %723 = vperm.xlu2 %1303, %v1610_v16  }
  0x5b   : > { %666 = vperm.xlu1 %1300, %v1610_v16  }
  0x63   : > { %1305 = vset.pattern.permute.xlu1 %v1425_v20 }
  0x64   : > { %719 = vperm.xlu1 %1305, %v1557_v0  }
  0x6c   : > { %1307 = vset.pattern.permute.xlu1 %v1431_v9 }
  0x78   : > { %v1668_v49 = vpop.permute.xlu2 %486 }
  0x80   : > { %v1682_v57 = vpop.permute.xlu2 %491 }
  0x89   : > { %v1693_v60 = vpop.permute.xlu2 %540 }
  0x8f   : > { %v1636_v21 = vpop.permute.xlu0 %496 }
  0x90   : > { %v375_v45 = vpop.permute.xlu1 %374 }
  0x91   : > { %v1707_v63 = vpop.permute.xlu2 %552 }
  0x98   : > { %v365_v22 = vpop.permute.xlu0 %364 }
  0x99   : > { %v380_v61 = vpop.permute.xlu1 %379 }
  0x9a   : > { %v1719_v10 = vpop.permute.xlu2 %605 }
  0xa0   : > { %v370_v34 = vpop.permute.xlu0 %369 }
  0xa2   : > { %v1711_v6 = vpop.permute.xlu1 %501 }
  0xa3   : > { %v1732_v17 = vpop.permute.xlu2 %658 }
  0xa7   : > { %v415_v24 = vpop.f32.mrf.mxu0 }
  0xa8   : > { %v434_v25 = vpop.f32.mrf.mxu1  ;;  %v416_v26 = vadd.f32 %v415_v24, %v365_v22 }
  0xa9   : > { %v435_v27 = vadd.f32 %v434_v25, %v365_v22  ;;  %v1753_v22 = vpop.permute.xlu0 %544 }
  0xaa   : > { %v444_v30 = vmax.f32 %v416_v26, 0.0 }
  0xab   : > { %v445_v31 = vmax.f32 %v435_v27, 0.0  ;;  %v1726_v14 = vpop.permute.xlu1 %548 }
  0xac   : > { %v452_v32 = vmin.f32 %v444_v30, 6.0  ;;  %v1745_v20 = vpop.permute.xlu2 %711 }
  0xad   : > { %v453_v33 = vmin.f32 %v445_v31, 6.0 }
  0xae   : > { %v1648_v35 = vmul.f32 %v1643_v28, %v452_v32 }
  0xaf   : > { %v1651_v36 = vmul.f32 %v1645_v29, %v453_v33  ;;  %v417_v37 = vpop.f32.mrf.mxu0  ;;  %v528_v33 = vlaneseq }
  0xb0   : > { %v436_v38 = vpop.f32.mrf.mxu1  ;;  %512 = vrot.lane.b32.xlu2 %v1648_v35, %s1427_s24  ;;  %v418_v40 = vadd.f32 %v417_v37, %v370_v34 }
  0xb1   : > { %v437_v39 = vadd.f32 %v436_v38, %v370_v34  ;;  %636 = vrot.lane.b32.xlu0 %v1651_v36, %s1426_s21  ;;  %520 = vrot.lane.b32.xlu1 %v1651_v36, %s1427_s24  ;;  %v598_v25 = vpop.permute.xlu0 %597  ;;  %v1792_v38 = vand.u32 127, %v528_v33 }
  0xb2   : > { %v446_v43 = vmax.f32 %v418_v40, 0.0 }
  0xb3   : > { %v447_v41 = vmax.f32 %v437_v39, 0.0  ;;  %vm644_vm2 = vcmp.lt.s32.totalorder %v1792_v38, 17  ;;  %vm530_vm3 = vcmp.lt.s32.totalorder %v1792_v38, 19  ;;  %vm587_vm4 = vcmp.lt.s32.totalorder %v1792_v38, 18 }
  0xb4   : > { %v454_v47 = vmin.f32 %v446_v43, 6.0  ;;  %v1743_v19 = vpop.permute.xlu1 %601  ;;  %v1763_v24 = vpop.permute.xlu2 %723  ;;  %vm701_vm5 = vcmp.lt.s32.totalorder %v1792_v38, 1  ;;  %vm758_vm6 = vcmp.lt.s32.totalorder %v1792_v38, 127  ;;  %vm815_vm7 = vcmp.lt.s32.totalorder %v1792_v38, 111 }
  0xb5   : > { %v455_v42 = vmin.f32 %v447_v41, 6.0  ;;  %vm872_vm8 = vcmp.lt.s32.totalorder %v1792_v38, 110  ;;  %vm929_vm9 = vcmp.lt.s32.totalorder %v1792_v38, 109 }
  0xb6   : > { %v1671_v50 = vmul.f32 %v1643_v28, %v454_v47 }
  0xb7   : > { %v1660_v44 = vmul.f32 %v1645_v29, %v455_v42  ;;  %v420_v52 = vpop.f32.mrf.mxu0 }
  0xb8   : > { %v439_v46 = vpop.f32.mrf.mxu1  ;;  %579 = vrot.lane.b32.xlu2 %v1651_v36, %s1428_s11  ;;  %v421_v53 = vadd.f32 %v420_v52, %v375_v45  ;;  %v505_v52 = vmul.f32 %v1668_v49, %v1651_v36 }
  0xb9   : > { %581 = vrot.lane.b32.xlu0 %v1660_v44, %s1428_s11  ;;  %571 = vrot.lane.b32.xlu1 %v1648_v35, %s1428_s11  ;;  %v440_v48 = vadd.f32 %v439_v46, %v375_v45 }
  0xba   : > { %v448_v55 = vmax.f32 %v421_v53, 0.0 }
  0xbb   : > { %v449_v51 = vmax.f32 %v440_v48, 0.0 }
  0xbc   : > { %v456_v58 = vmin.f32 %v448_v55, 6.0  ;;  %v1755_v23 = vpop.permute.xlu1 %609 }
  0xbd   : > { %v457_v54 = vmin.f32 %v449_v51, 6.0  ;;  %v504_v51 = vmul.f32 %v1668_v49, %v1648_v35 }
  0xbe   : > { %v1691_v59 = vmul.f32 %v1643_v28, %v456_v58 }
  0xbf   : > { %v1680_v56 = vmul.f32 %v1645_v29, %v457_v54  ;;  %v422_v62 = vpop.f32.mrf.mxu0 }
  0xc0   : > { %628 = vrot.lane.b32.xlu2 %v1648_v35, %s1426_s21  ;;  %v423_v1 = vadd.f32 %v422_v62, %v380_v61  ;;  %v441_v5 = vpop.f32.mrf.mxu1 }
  0xc1   : > { %630 = vrot.lane.b32.xlu0 %v1671_v50, %s1426_s21  ;;  %693 = vrot.lane.b32.xlu1 %v1651_v36, %s1429_s13  ;;  %v442_v8 = vadd.f32 %v441_v5, %v380_v61 }
  0xc2   : > { %v450_v3 = vmax.f32 %v423_v1, 0.0 }
  0xc3   : > { %v451_v13 = vmax.f32 %v442_v8, 0.0 }
  0xc4   : > { %v458_v7 = vmin.f32 %v450_v3, 6.0 }
  0xc5   : > { %v459_v15 = vmin.f32 %v451_v13, 6.0  ;;  %v655_v26 = vpop.permute.xlu1 %654 }
  0xc6   : > { %v1722_v12 = vmul.f32 %v1643_v28, %v458_v7  ;;  %v1770_v28 = vpop.permute.xlu0 %662 }
  0xc7   : > { %v1735_v18 = vmul.f32 %v1645_v29, %v459_v15  ;;  %v1433_v29 = vmov 6  }
  0xc8   : > { %685 = vrot.lane.b32.xlu2 %v1648_v35, %s1429_s13 }
  0xc9   : > { %524 = vrot.lane.b32.xlu0 %v1680_v56, %s1427_s24  ;;  %742 = vrot.lane.b32.xlu1 %v1648_v35, %s1430_s14 }
  0xca   : > { %1309 = vset.pattern.permute.xlu2 %v1433_v29 }
  0xcd   : > { %v1775_v30 = vpop.permute.xlu1 %666 }
  0xce   : > { %v1784_v32 = vpop.permute.xlu0 %715 }
  0xd0   : > { %750 = vrot.lane.b32.xlu2 %v1651_v36, %s1430_s14 }
  0xd1   : > { %575 = vrot.lane.b32.xlu0 %v1691_v59, %s1428_s11  ;;  %514 = vrot.lane.b32.xlu1 %v1671_v50, %s1427_s24 }
  0xd6   : > { %v1790_v34 = vpop.permute.xlu1 %719 }
  0xd8   : > { %522 = vrot.lane.b32.xlu2 %v1660_v44, %s1427_s24 }
  0xd9   : > { %697 = vrot.lane.b32.xlu0 %v1680_v56, %s1429_s13  ;;  %638 = vrot.lane.b32.xlu1 %v1660_v44, %s1426_s21 }
  0xe0   : > { %573 = vrot.lane.b32.xlu2 %v1671_v50, %s1428_s11 }
  0xe1   : > { %746 = vrot.lane.b32.xlu0 %v1691_v59, %s1430_s14  ;;  %687 = vrot.lane.b32.xlu1 %v1671_v50, %s1429_s13 }
  0xe8   : > { %695 = vrot.lane.b32.xlu2 %v1660_v44, %s1429_s13 }
  0xe9   : > { %518 = vrot.lane.b32.xlu0 %v1722_v12, %s1427_s24  ;;  %583 = vrot.lane.b32.xlu1 %v1680_v56, %s1428_s11 }
  0xf0   : > { %744 = vrot.lane.b32.xlu2 %v1671_v50, %s1430_s14 }
  0xf1   : > { %642 = vrot.lane.b32.xlu0 %v1735_v18, %s1426_s21  ;;  %632 = vrot.lane.b32.xlu1 %v1691_v59, %s1426_s21 }
  0xf8   : > { %516 = vrot.lane.b32.xlu2 %v1691_v59, %s1427_s24 }
  0xf9   : > { %691 = vrot.lane.b32.xlu0 %v1722_v12, %s1429_s13  ;;  %526 = vrot.lane.b32.xlu1 %v1735_v18, %s1427_s24  ;;  %s1069_s24 = sadd.s32 %s1196_s16, %s1195_s15 }
 0x100   : > { %640 = vrot.lane.b32.xlu2 %v1680_v56, %s1426_s21 }
 0x101   : > { %752 = vrot.lane.b32.xlu0 %v1660_v44, %s1430_s14  ;;  %577 = vrot.lane.b32.xlu1 %v1722_v12, %s1428_s11 }
 0x108   : > { %689 = vrot.lane.b32.xlu2 %v1691_v59, %s1429_s13 }
 0x109   : > { %776 = vperm.xlu0 %1306, %v1557_v0   ;;  %699 = vrot.lane.b32.xlu1 %v1735_v18, %s1429_s13  ;;  %s1197_s13 = sshll.u32 %s1069_s24, 3 }
 0x10a   : > { %v513_v27 = vpop.permute.xlu2 %512 }
 0x110   : > { %585 = vrot.lane.b32.xlu2 %v1735_v18, %s1428_s11 }
 0x111   : > { %813 = vrot.lane.b32.xlu0 %v1735_v18, %s1432_s17  ;;  %748 = vrot.lane.b32.xlu1 %v1722_v12, %s1430_s14 }
 0x112   : > { %1314 = vset.pattern.permute.xlu0 %v1433_v29  ;;  %v580_v31 = vpop.permute.xlu2 %579 }
 0x118   : > { %634 = vrot.lane.b32.xlu2 %v1722_v12, %s1426_s21  ;;  %s333_s21 = sand.u32 1, %s1395_s28  }
 0x119   : > { %860 = vrot.lane.b32.xlu0 %v1691_v59, %s1434_s26  ;;  %754 = vrot.lane.b32.xlu1 %v1680_v56, %s1430_s14  ;;  %s1175_s11 = sshll.u32 %s333_s21, 4  ;;  %s1058_s30 = scalar_lea.sflag [#allocation3], %s333_s21 }
 0x11a   : > { %v629_v37 = vpop.permute.xlu2 %628 }
 0x120   : > { %756 = vrot.lane.b32.xlu2 %v1735_v18, %s1430_s14 }
 0x121   : > { %870 = vrot.lane.b32.xlu0 %v1735_v18, %s1434_s26  ;;  %780 = vperm.xlu1 %1307, %v1610_v16  }
 0x122   : > { %v686_v43 = vpop.permute.xlu2 %685 }
 0x123   : > { %v637_v39 = vpop.permute.xlu0 %636  ;;  %v521_v42 = vpop.permute.xlu1 %520 }
 0x124   : > { %v645_v40 = vsel %vm644_vm2, %v629_v37, %v637_v39  ;;  %v649_v41 = vsel %vm644_vm2, %v637_v39, %v629_v37  ;;  %v531_v47 = vsel %vm530_vm3, %v513_v27, %v521_v42  ;;  %v535_v48 = vsel %vm530_vm3, %v521_v42, %v513_v27 }
 0x125   : > { %v669_v45 = vmul.f32 %v655_v26, %v649_v41  ;;  %v670_v46 = vmul.f32 %v655_v26, %v645_v40  ;;  %v555_v53 = vmul.f32 %v1693_v60, %v535_v48  ;;  %v556_v54 = vmul.f32 %v1693_v60, %v531_v47 }
 0x127   : > { %v563_v55 = vadd.f32 %v555_v53, %v504_v51  ;;  %v564_v58 = vadd.f32 %v556_v54, %v505_v52  ;;  %v1436_v51 = vmov 7  }
 0x128   : > { %803 = vrot.lane.b32.xlu2 %v1691_v59, %s1432_s17 }
 0x129   : > { %809 = vrot.lane.b32.xlu0 %v1660_v44, %s1432_s17  ;;  %805 = vrot.lane.b32.xlu1 %v1722_v12, %s1432_s17 }
 0x12a   : > { %1308 = vset.pattern.permute.xlu1 %v1433_v29  ;;  %v751_v62 = vpop.permute.xlu2 %750 }
 0x12b   : > { %v582_v61 = vpop.permute.xlu0 %581  ;;  %v572_v49 = vpop.permute.xlu1 %571 }
 0x12c   : > { %v588_v60 = vsel %vm587_vm4, %v572_v49, %v580_v31  ;;  %v592_v1 = vsel %vm587_vm4, %v580_v31, %v572_v49  ;;  %v507_v49 = vmul.f32 %v1682_v57, %v1660_v44 }
 0x12d   : > { %v612_v3 = vmul.f32 %v598_v25, %v592_v1  ;;  %v613_v5 = vmul.f32 %v598_v25, %v588_v60 }
 0x12f   : > { %v620_v7 = vadd.f32 %v612_v3, %v563_v55  ;;  %v621_v8 = vadd.f32 %v613_v5, %v564_v58 }
 0x130   : > { %811 = vrot.lane.b32.xlu2 %v1680_v56, %s1432_s17 }
 0x131   : > { %925 = vrot.lane.b32.xlu0 %v1680_v56, %s1435_s22  ;;  %833 = vperm.xlu1 %1308, %v1557_v0   ;;  %v677_v13 = vadd.f32 %v669_v45, %v620_v7  ;;  %v678_v15 = vadd.f32 %v670_v46, %v621_v8 }
 0x132   : > { %v523_v31 = vpop.permute.xlu2 %522 }
 0x133   : > { %v631_v26 = vpop.permute.xlu0 %630  ;;  %v694_v27 = vpop.permute.xlu1 %693 }
 0x134   : > { %v702_v25 = vsel %vm701_vm5, %v686_v43, %v694_v27  ;;  %v706_v33 = vsel %vm701_vm5, %v694_v27, %v686_v43 }
 0x135   : > { %v726_v37 = vmul.f32 %v1745_v20, %v706_v33  ;;  %v727_v39 = vmul.f32 %v1745_v20, %v702_v25 }
 0x137   : > { %v1839_v40 = vadd.f32 %v726_v37, %v677_v13  ;;  %v1841_v41 = vadd.f32 %v727_v39, %v678_v15 }
 0x138   : > { %837 = vperm.xlu2 %1309, %v1610_v16  }
 0x139   : > { %829 = vperm.xlu0 %1314, %v1596_v11   ;;  %862 = vrot.lane.b32.xlu1 %v1722_v12, %s1434_s26 }
 0x13a   : > { %1310 = vset.pattern.permute.xlu1 %v1431_v9  ;;  %v574_v45 = vpop.permute.xlu2 %573 }
 0x13b   : > { %v525_v42 = vpop.permute.xlu0 %524  ;;  %v743_v43 = vpop.permute.xlu1 %742  ;;  %v589_v47 = vsel %vm587_vm4, %v574_v45, %v582_v61  ;;  %v593_v48 = vsel %vm587_vm4, %v582_v61, %v574_v45  ;;  %v506_v61 = vmul.f32 %v1682_v57, %v1671_v50  ;;  %v1437_v45 = vmov 8  }
 0x13c   : > { %v1851_v20 = vsel %vm758_vm6, %v743_v43, %v751_v62  ;;  %v1855_v46 = vsel %vm758_vm6, %v751_v62, %v743_v43  ;;  %v615_v1 = vmul.f32 %v1743_v19, %v589_v47  ;;  %v509_v43 = vmul.f32 %v1636_v21, %v1680_v56 }
 0x140   : > { %868 = vrot.lane.b32.xlu2 %v1680_v56, %s1434_s26 }
 0x141   : > { %1315 = vset.pattern.permute.xlu0 %v1436_v51  ;;  %768 = vperm.xlu1 %1310, %v1570_v4  }
 0x142   : > { %890 = vperm.xlu0 %1315, %v1557_v0   ;;  %1311 = vset.pattern.permute.xlu2 %v1431_v9  ;;  %v696_v54 = vpop.permute.xlu2 %695  ;;  %v614_v9 = vmul.f32 %v1743_v19, %v593_v48 }
 0x143   : > { %v576_v52 = vpop.permute.xlu0 %575  ;;  %v515_v53 = vpop.permute.xlu1 %514 }
 0x144   : > { %v532_v55 = vsel %vm530_vm3, %v515_v53, %v523_v31  ;;  %v536_v58 = vsel %vm530_vm3, %v523_v31, %v515_v53 }
 0x145   : > { %v557_v62 = vmul.f32 %v1753_v22, %v536_v58  ;;  %v558_v60 = vmul.f32 %v1753_v22, %v532_v55 }
 0x147   : > { %v565_v3 = vadd.f32 %v557_v62, %v506_v61  ;;  %v566_v5 = vadd.f32 %v558_v60, %v507_v49 }
 0x148   : > { %772 = vperm.xlu2 %1311, %v1596_v11  }
 0x149   : > { %1312 = vset.pattern.permute.xlu1 %v1436_v51  ;;  %v622_v7 = vadd.f32 %v614_v9, %v565_v3  ;;  %v623_v8 = vadd.f32 %v615_v1, %v566_v5 }
 0x14a   : > { %864 = vrot.lane.b32.xlu0 %v1651_v36, %s1434_s26  ;;  %894 = vperm.xlu1 %1312, %v1610_v16   ;;  %v1884_v22 = vpop.permute.xlu2 %744 }
 0x14b   : > { %v698_v57 = vpop.permute.xlu0 %697  ;;  %v639_v13 = vpop.permute.xlu1 %638 }
 0x14c   : > { %v646_v19 = vsel %vm644_vm2, %v631_v26, %v639_v13  ;;  %v650_v15 = vsel %vm644_vm2, %v639_v13, %v631_v26  ;;  %v508_v26 = vmul.f32 %v1636_v21, %v1691_v59 }
 0x14d   : > { %v671_v27 = vmul.f32 %v1732_v17, %v650_v15  ;;  %v672_v31 = vmul.f32 %v1732_v17, %v646_v19 }
 0x14f   : > { %v679_v25 = vadd.f32 %v671_v27, %v622_v7  ;;  %v680_v33 = vadd.f32 %v672_v31, %v623_v8 }
 0x150   : > { %799 = vrot.lane.b32.xlu2 %v1648_v35, %s1432_s17 }
 0x151   : > { %1313 = vset.pattern.permute.xlu2 %v1433_v29 }
 0x152   : > { %801 = vrot.lane.b32.xlu1 %v1671_v50, %s1432_s17  ;;  %v517_v17 = vpop.permute.xlu2 %516  ;;  %886 = vperm.xlu0 %1315, %v1596_v11  }
 0x153   : > { %v1896_v37 = vpop.permute.xlu0 %746  ;;  %v688_v39 = vpop.permute.xlu1 %687  ;;  %1316 = vset.pattern.permute.xlu1 %v1437_v45  ;;  %v533_v29 = vsel %vm530_vm3, %v517_v17, %v525_v42  ;;  %v537_v53 = vsel %vm530_vm3, %v525_v42, %v517_v17 }
 0x154   : > { %v703_v47 = vsel %vm701_vm5, %v688_v39, %v696_v54  ;;  %v707_v48 = vsel %vm701_vm5, %v696_v54, %v688_v39  ;;  %v559_v56 = vmul.f32 %v1726_v14, %v537_v53  ;;  %v560_v58 = vmul.f32 %v1726_v14, %v533_v29 }
 0x155   : > { %v728_v55 = vmul.f32 %v1784_v32, %v707_v48  ;;  %v729_v21 = vmul.f32 %v1784_v32, %v703_v47  ;;  %v511_v53 = vmul.f32 %v1711_v6, %v1735_v18 }
 0x156   : > { %v567_v62 = vadd.f32 %v559_v56, %v508_v26  ;;  %v568_v54 = vadd.f32 %v560_v58, %v509_v43 }
 0x157   : > { %v1916_v61 = vadd.f32 %v728_v55, %v679_v25  ;;  %v1918_v49 = vadd.f32 %v729_v21, %v680_v33 }
 0x158   : > { %807 = vrot.lane.b32.xlu2 %v1651_v36, %s1432_s17 }
 0x15a   : > { %917 = vrot.lane.b32.xlu1 %v1691_v59, %s1435_s22  ;;  %v641_v9 = vpop.permute.xlu2 %640  ;;  %1319 = vset.pattern.permute.xlu0 %v1437_v45 }
 0x15b   : > { %v519_v42 = vpop.permute.xlu0 %518  ;;  %v584_v60 = vpop.permute.xlu1 %583  ;;  %939 = vperm.xlu0 %1319, %v1570_v4  }
 0x15c   : > { %v590_v32 = vsel %vm587_vm4, %v576_v52, %v584_v60  ;;  %v594_v14 = vsel %vm587_vm4, %v584_v60, %v576_v52 }
 0x15d   : > { %v616_v1 = vmul.f32 %v1719_v10, %v594_v14  ;;  %v617_v3 = vmul.f32 %v1719_v10, %v590_v32 }
 0x15f   : > { %v624_v5 = vadd.f32 %v616_v1, %v567_v62  ;;  %v625_v7 = vadd.f32 %v617_v3, %v568_v54 }
 0x160   : > { %919 = vrot.lane.b32.xlu2 %v1722_v12, %s1435_s22 }
 0x162   : > { %927 = vrot.lane.b32.xlu1 %v1735_v18, %s1435_s22  ;;  %v690_v13 = vpop.permute.xlu2 %689 }
 0x163   : > { %v643_v59 = vpop.permute.xlu0 %642  ;;  %v633_v8 = vpop.permute.xlu1 %632  ;;  %v704_v10 = vsel %vm701_vm5, %v690_v13, %v698_v57  ;;  %v708_v15 = vsel %vm701_vm5, %v698_v57, %v690_v13  ;;  %1322 = vset.pattern.permute.xlu0 %v1422_v2 }
 0x164   : > { %v647_v52 = vsel %vm644_vm2, %v633_v8, %v641_v9  ;;  %v651_v19 = vsel %vm644_vm2, %v641_v9, %v633_v8  ;;  %v730_v39 = vmul.f32 %v1790_v34, %v708_v15  ;;  %v731_v26 = vmul.f32 %v1790_v34, %v704_v10 }
 0x165   : > { %v673_v27 = vmul.f32 %v1770_v28, %v651_v19  ;;  %v674_v31 = vmul.f32 %v1770_v28, %v647_v52  ;;  %v510_v34 = vmul.f32 %v1711_v6, %v1722_v12 }
 0x167   : > { %v681_v25 = vadd.f32 %v673_v27, %v624_v5  ;;  %v682_v33 = vadd.f32 %v674_v31, %v625_v7 }
 0x168   : > { %825 = vperm.xlu2 %1313, %v1570_v4  }
 0x169   : > { %v1948_v43 = vadd.f32 %v730_v39, %v681_v25  ;;  %v1950_v17 = vadd.f32 %v731_v26, %v682_v33 }
 0x16a   : > { %947 = vperm.xlu1 %1316, %v1557_v0   ;;  %v586_v48 = vpop.permute.xlu2 %585 }
 0x16b   : > { %v692_v57 = vpop.permute.xlu0 %691  ;;  %v527_v47 = vpop.permute.xlu1 %526 }
 0x16c   : > { %v534_v28 = vsel %vm530_vm3, %v519_v42, %v527_v47  ;;  %v538_v29 = vsel %vm530_vm3, %v527_v47, %v519_v42 }
 0x16d   : > { %v561_v55 = vmul.f32 %v1707_v63, %v538_v29  ;;  %v562_v21 = vmul.f32 %v1707_v63, %v534_v28 }
 0x16f   : > { %v569_v0 = vadd.f32 %v561_v55, %v510_v34  ;;  %v570_v56 = vadd.f32 %v562_v21, %v511_v53 }
 0x170   : > { %1317 = vset.pattern.permute.xlu2 %v1437_v45 }
 0x171   : > { %951 = vperm.xlu2 %1317, %v1610_v16  }
 0x172   : > { %856 = vrot.lane.b32.xlu1 %v1648_v35, %s1434_s26  ;;  %v635_v18 = vpop.permute.xlu2 %634 }
 0x173   : > { %v753_v58 = vpop.permute.xlu0 %752  ;;  %v578_v63 = vpop.permute.xlu1 %577  ;;  %v648_v16 = vsel %vm644_vm2, %v635_v18, %v643_v59  ;;  %v652_v54 = vsel %vm644_vm2, %v643_v59, %v635_v18 }
 0x174   : > { %v1970_v12 = vsel %vm758_vm6, %v1884_v22, %v753_v58  ;;  %v1975_v6 = vsel %vm758_vm6, %v753_v58, %v1884_v22  ;;  %v591_v45 = vsel %vm587_vm4, %v578_v63, %v586_v48  ;;  %v595_v62 = vsel %vm587_vm4, %v586_v48, %v578_v63  ;;  %v479_v22 = vld [vmem:[%s2168_s5 + $0x8] sm:$0xff] }
 0x175   : > { %v618_v42 = vmul.f32 %v1755_v23, %v595_v62  ;;  %v619_v60 = vmul.f32 %v1755_v23, %v591_v45  ;;  %977 = vperm.xlu0 %1322, %v479_v22   ;;  %v675_v14 = vmul.f32 %v1775_v30, %v652_v54  ;;  %v676_v1 = vmul.f32 %v1775_v30, %v648_v16  ;;  %v478_v16 = vld [vmem:[%s2168_s5] sm:$0xff] }
 0x177   : > { %v626_v9 = vadd.f32 %v618_v42, %v569_v0  ;;  %v627_v32 = vadd.f32 %v619_v60, %v570_v56  ;;  %v480_v0 = vld [vmem:[%s2168_s5 + $0x10] sm:$0xff] }
 0x179   : > { %v683_v3 = vadd.f32 %v675_v14, %v626_v9  ;;  %v684_v5 = vadd.f32 %v676_v1, %v627_v32  ;;  %858 = vrot.lane.b32.xlu2 %v1671_v50, %s1434_s26 }
 0x17a   : > { %866 = vrot.lane.b32.xlu1 %v1660_v44, %s1434_s26  ;;  %v757_v59 = vpop.permute.xlu2 %756  ;;  %1318 = vset.pattern.permute.xlu2 %v1436_v51  ;;  %s1071_s26 = scalar_lea.hbm %s2171_s8, %s1197_s13 }
 0x17b   : > { %v777_v23 = vpop.permute.xlu0 %776  ;;  %v700_v7 = vpop.permute.xlu1 %699  ;;  %s1075_s0 = sshll.u32 %s1071_s26, 4  ;;  %s1076_s0 = int_to_ptr.hbm [resolvable:$true] %s1075_s0 }
 0x17c   : > { %v705_v8 = vsel %vm701_vm5, %v692_v57, %v700_v7  ;;  %v709_v13 = vsel %vm701_vm5, %v700_v7, %v692_v57  ;;  %s1339_s9 = sshra.s32 %s1076_s0, 4  ;;  %s1340_s9 = int_to_ptr.hbm [resolvable:$true] %s1339_s9 }
 0x17d   : > { %v732_v30 = vmul.f32 %v1763_v24, %v709_v13  ;;  %v733_v52 = vmul.f32 %v1763_v24, %v705_v8  ;;  %s1341_s15 = scalar_lea.hbm %s1340_s9, 16  ;;  %p1346_p4 = scmp.lt.s32.totalorder %s1340_s9, %s2171_s8 }
 0x17e   : > { %p1342_p0 = scmp.ne.s32.totalorder %s1340_s9, %s1341_s15 }
 0x17f   : > { %v740_v19 = vadd.f32 %v732_v30, %v683_v3  ;;  %v741_v10 = vadd.f32 %v733_v52, %v684_v5 }
 0x180   : > { %p1343_p1 = pnand %p1342_p0, %p1534_p3 }
 0x181   : > { %882 = vperm.xlu2 %1318, %v1570_v4  }
 0x182   : > { %913 = vrot.lane.b32.xlu1 %v1648_v35, %s1435_s22  ;;  %v804_v51 = vpop.permute.xlu2 %803  ;;  %p1344_p2 = pneg %p1343_p1 }
 0x183   : > { %v814_v15 = vpop.permute.xlu0 %813  ;;  %v749_v27 = vpop.permute.xlu1 %748 }
 0x184   : > { %v762_v31 = vsel %vm758_vm6, %v749_v27, %v757_v59  ;;  %v766_v25 = vsel %vm758_vm6, %v757_v59, %v749_v27 }
 0x189   : > { %915 = vrot.lane.b32.xlu2 %v1671_v50, %s1435_s22 }
 0x18a   : > { %921 = vrot.lane.b32.xlu1 %v1651_v36, %s1435_s22  ;;  %v812_v4 = vpop.permute.xlu2 %811  ;;  %1320 = vset.pattern.permute.xlu2 %v1422_v2 }
 0x18b   : > { %v861_v35 = vpop.permute.xlu0 %860  ;;  %v755_v24 = vpop.permute.xlu1 %754  ;;  %v818_v26 = vsel %vm815_vm7, %v804_v51, %v812_v4  ;;  %v822_v36 = vsel %vm815_vm7, %v812_v4, %v804_v51 }
 0x18c   : > { %v761_v33 = vsel %vm758_vm6, %v1896_v37, %v755_v24  ;;  %v765_v39 = vsel %vm758_vm6, %v755_v24, %v1896_v37 }
 0x18d   : > { %v787_v50 = vmul.f32 %v777_v23, %v761_v33  ;;  %v788_v57 = vmul.f32 %v777_v23, %v765_v39 }
 0x18f   : > { %v795_v47 = vadd.f32 %v787_v50, %v1948_v43  ;;  %v796_v48 = vadd.f32 %v788_v57, %v1950_v17  ;;  %v481_v43 = vld [vmem:[%s2168_s5 + $0x18] sm:$0xff] }
 0x191   : > { %923 = vrot.lane.b32.xlu2 %v1660_v44, %s1435_s22  ;;  %s335_s22 = scalar_lea.vmem [#allocation2], %s1175_s11  ;;  %s1345_s11 = scalar_lea.hbm %s2171_s8, 64 }
 0x192   : > { %943 = vperm.xlu1 %1316, %v1596_v11   ;;  %v838_v37 = vpop.permute.xlu2 %837  ;;  %s1073_s25 = sshll.u32 %s335_s22, 4  ;;  %p1347_p5 = scmp.lt.s32.totalorder %s1345_s11, %s1341_s15  ;;  %s1074_s25 = int_to_ptr.vmem [resolvable:$true] %s1073_s25 }
 0x193   : > { %v871_v28 = vpop.permute.xlu0 %870  ;;  %v781_v29 = vpop.permute.xlu1 %780 }
 0x194   : > { %v789_v34 = vmul.f32 %v781_v29, %v762_v31  ;;  %v790_v53 = vmul.f32 %v781_v29, %v766_v25  ;;  %p1348_p6 = por %p1347_p5, %p1346_p4 }
 0x196   : > { %v797_v55 = vadd.f32 %v789_v34, %v740_v19  ;;  %v798_v21 = vadd.f32 %v790_v53, %v741_v10  ;;  %p1349_p7 = pnand %p1348_p6, %p1344_p2 }
 0x199   : > { %982 = vperm.xlu2 %1320, %v480_v0  }
 0x19a   : > { %1321 = vset.pattern.permute.xlu1 %v1422_v2  ;;  %v869_v17 = vpop.permute.xlu2 %868  ;;  %v483_v2 = vld [vmem:[%s2170_s7] sm:$0xff] }
 0x19b   : > { %v810_v11 = vpop.permute.xlu0 %809  ;;  %987 = vperm.xlu1 %1321, %v481_v43   ;;  %v806_v44 = vpop.permute.xlu1 %805  ;;  %v875_v52 = vsel %vm872_vm8, %v861_v35, %v869_v17 }
 0x19c   : > { %v819_v56 = vsel %vm815_vm7, %v806_v44, %v814_v15  ;;  %v823_v58 = vsel %vm815_vm7, %v814_v15, %v806_v44 }
 0x19d   : > { %v846_v63 = vmul.f32 %v838_v37, %v819_v56  ;;  %v847_v18 = vmul.f32 %v838_v37, %v823_v58 }
 0x19f   : > { %v854_v45 = vadd.f32 %v846_v63, %v797_v55  ;;  %v855_v62 = vadd.f32 %v847_v18, %v798_v21 }
 0x1a1   : > { %972 = vperm.xlu2 %1320, %v478_v16  }
 0x1a2   : > { %v773_v60 = vpop.permute.xlu2 %772 }
 0x1a3   : > { %v2048_v54 = vpop.permute.xlu0 %925  ;;  %1020 = vperm.xlu1 %1321, %v483_v2   ;;  %v834_v42 = vpop.permute.xlu1 %833  ;;  %v785_v32 = vmul.f32 %v773_v60, %v1970_v12  ;;  %v786_v14 = vmul.f32 %v773_v60, %v1975_v6  ;;  %v879_v12 = vsel %vm872_vm8, %v869_v17, %v861_v35 }
 0x1a4   : > { %v844_v22 = vmul.f32 %v834_v42, %v818_v26  ;;  %v845_v9 = vmul.f32 %v834_v42, %v822_v36 }
 0x1a5   : > { %v793_v5 = vadd.f32 %v785_v32, %v1916_v61  ;;  %v794_v23 = vadd.f32 %v786_v14, %v1918_v49 }
 0x1a6   : > { %v852_v1 = vadd.f32 %v844_v22, %v795_v47  ;;  %v853_v3 = vadd.f32 %v845_v9, %v796_v48 }
 0x1aa   : > { %v800_v8 = vpop.permute.xlu2 %799 }
 0x1ab   : > { %v830_v7 = vpop.permute.xlu0 %829  ;;  %v863_v59 = vpop.permute.xlu1 %862 }
 0x1ac   : > { %v876_v24 = vsel %vm872_vm8, %v863_v59, %v871_v28 }
 0x1b2   : > { %v808_v30 = vpop.permute.xlu2 %807 }
 0x1b3   : > { %v769_v13 = vpop.permute.xlu1 %768 }
 0x1b4   : > { %v783_v6 = vmul.f32 %v769_v13, %v1851_v20  ;;  %v784_v19 = vmul.f32 %v769_v13, %v1855_v46  ;;  %v891_v61 = vpop.permute.xlu0 %890  ;;  %v880_v20 = vsel %vm872_vm8, %v871_v28, %v863_v59 }
 0x1b5   : > { %v901_v10 = vmul.f32 %v891_v61, %v875_v52  ;;  %v902_v49 = vmul.f32 %v891_v61, %v879_v12 }
 0x1b6   : > { %v791_v15 = vadd.f32 %v783_v6, %v1839_v40  ;;  %v792_v27 = vadd.f32 %v784_v19, %v1841_v41  ;;  %v816_v40 = vsel %vm815_vm7, %v800_v8, %v808_v30  ;;  %v820_v41 = vsel %vm815_vm7, %v808_v30, %v800_v8 }
 0x1b7   : > { %v2063_v51 = vadd.f32 %v901_v10, %v852_v1  ;;  %v2065_v31 = vadd.f32 %v902_v49, %v853_v3 }
 0x1ba   : > { %v920_v25 = vpop.permute.xlu2 %919 }
 0x1bc   : > { %v895_v35 = vpop.permute.xlu1 %894  ;;  %v865_v18 = vpop.permute.xlu0 %864 }
 0x1bd   : > { %v903_v46 = vmul.f32 %v895_v35, %v876_v24  ;;  %v904_v4 = vmul.f32 %v895_v35, %v880_v20 }
 0x1bf   : > { %v2071_v33 = vadd.f32 %v903_v46, %v854_v45  ;;  %v2073_v39 = vadd.f32 %v904_v4, %v855_v62 }
 0x1c2   : > { %v826_v26 = vpop.permute.xlu2 %825 }
 0x1c3   : > { %v840_v36 = vmul.f32 %v826_v26, %v816_v40  ;;  %v841_v50 = vmul.f32 %v826_v26, %v820_v41 }
 0x1c4   : > { %v802_v57 = vpop.permute.xlu1 %801  ;;  %v887_v16 = vpop.permute.xlu0 %886 }
 0x1c5   : > { %v817_v47 = vsel %vm815_vm7, %v802_v57, %v810_v11  ;;  %v821_v48 = vsel %vm815_vm7, %v810_v11, %v802_v57  ;;  %v848_v28 = vadd.f32 %v840_v36, %v791_v15  ;;  %v849_v29 = vadd.f32 %v841_v50, %v792_v27 }
 0x1c6   : > { %v842_v37 = vmul.f32 %v830_v7, %v817_v47  ;;  %v843_v34 = vmul.f32 %v830_v7, %v821_v48 }
 0x1c8   : > { %v850_v53 = vadd.f32 %v842_v37, %v793_v5  ;;  %v851_v55 = vadd.f32 %v843_v34, %v794_v23 }
 0x1cb   : > { %v952_v0 = vpop.permute.xlu2 %951 }
 0x1cc   : > { %v918_v21 = vpop.permute.xlu1 %917 }
 0x1cd   : > { %v940_v32 = vpop.permute.xlu0 %939  ;;  %v932_v19 = vsel %vm929_vm9, %v918_v21, %v2048_v54  ;;  %v936_v61 = vsel %vm929_vm9, %v2048_v54, %v918_v21 }
 0x1d3   : > { %v859_v44 = vpop.permute.xlu2 %858 }
 0x1d4   : > { %v928_v43 = vpop.permute.xlu1 %927 }
 0x1d5   : > { %v933_v49 = vsel %vm929_vm9, %v920_v25, %v928_v43  ;;  %v937_v15 = vsel %vm929_vm9, %v928_v43, %v920_v25 }
 0x1d6   : > { %v960_v48 = vmul.f32 %v952_v0, %v933_v49  ;;  %v961_v25 = vmul.f32 %v952_v0, %v937_v15 }
 0x1db   : > { %v883_v56 = vpop.permute.xlu2 %882 }
 0x1dc   : > { %v948_v17 = vpop.permute.xlu1 %947 }
 0x1dd   : > { %v958_v27 = vmul.f32 %v948_v17, %v932_v19  ;;  %v959_v24 = vmul.f32 %v948_v17, %v936_v61  ;;  %v968_v17 = vadd.f32 %v960_v48, %v2071_v33 }
 0x1e3   : > { %v916_v63 = vpop.permute.xlu2 %915 }
 0x1e4   : > { %v857_v58 = vpop.permute.xlu1 %856 }
 0x1e5   : > { %v873_v11 = vsel %vm872_vm8, %v857_v58, %v865_v18  ;;  %v877_v42 = vsel %vm872_vm8, %v865_v18, %v857_v58 }
 0x1e6   : > { %v897_v22 = vmul.f32 %v883_v56, %v873_v11  ;;  %v898_v9 = vmul.f32 %v883_v56, %v877_v42  ;;  %v969_v56 = vadd.f32 %v961_v25, %v2073_v39 }
 0x1e7   : > { %v978_v50 = vpop.permute.xlu0 %977 }
 0x1e8   : > { %v906_v8 = vadd.f32 %v898_v9, %v849_v29  ;;  %v905_v13 = vadd.f32 %v897_v22, %v848_v28  ;;  %v966_v28 = vadd.f32 %v958_v27, %v2063_v51  ;;  %v967_v29 = vadd.f32 %v959_v24, %v2065_v31 }
 0x1eb   : > { %v924_v62 = vpop.permute.xlu2 %923 }
 0x1ec   : > { %v867_v45 = vpop.permute.xlu1 %866  ;;  %v931_v20 = vsel %vm929_vm9, %v916_v63, %v924_v62  ;;  %v935_v35 = vsel %vm929_vm9, %v924_v62, %v916_v63 }
 0x1ed   : > { %v874_v1 = vsel %vm872_vm8, %v859_v44, %v867_v45  ;;  %v878_v3 = vsel %vm872_vm8, %v867_v45, %v859_v44 }
 0x1ee   : > { %v899_v30 = vmul.f32 %v887_v16, %v874_v1  ;;  %v900_v52 = vmul.f32 %v887_v16, %v878_v3  ;;  %v482_v1 = vld [vmem:[%s2169_s6] sm:$0xf] }
 0x1f0   : > { %v907_v46 = vadd.f32 %v899_v30, %v850_v53  ;;  %v908_v4 = vadd.f32 %v900_v52, %v851_v55  ;;  %v1324_v30 = vld [vmem:[%s1585_s20 + $0x8] sm:$0xff] }
 0x1f3   : > { %v983_v60 = vpop.permute.xlu2 %982 }
 0x1f4   : > { %v914_v2 = vpop.permute.xlu1 %913  ;;  %v994_v53 = vadd.f32 %v983_v60, %v966_v28  ;;  %v995_v55 = vadd.f32 %v983_v60, %v967_v29 }
 0x1f6   : > { %v1002_v51 = vmax.f32 %v994_v53, 0.0  ;;  %v1003_v62 = vmax.f32 %v995_v55, 0.0 }
 0x1f8   : > { %v1010_v22 = vmin.f32 %v1002_v51, 6.0  ;;  %v1011_v9 = vmin.f32 %v1003_v62, 6.0 }
 0x1fb   : > { %v973_v10 = vpop.permute.xlu2 %972 }
 0x1fc   : > { %v922_v14 = vpop.permute.xlu1 %921 }
 0x1fd   : > { %v930_v5 = vsel %vm929_vm9, %v914_v2, %v922_v14  ;;  %v934_v23 = vsel %vm929_vm9, %v922_v14, %v914_v2 }
 0x1fe   : > { %v954_v7 = vmul.f32 %v940_v32, %v930_v5  ;;  %v955_v59 = vmul.f32 %v940_v32, %v934_v23 }
 0x200   : > { %v963_v12 = vadd.f32 %v955_v59, %v906_v8  ;;  %v962_v6 = vadd.f32 %v954_v7, %v905_v13  ;;  %v1323_v8 = vld [vmem:[%s1585_s20] sm:$0xff] }
 0x202   : > { %v990_v41 = vadd.f32 %v973_v10, %v962_v6  ;;  %v991_v54 = vadd.f32 %v973_v10, %v963_v12 }
 0x204   : > { %v944_v40 = vpop.permute.xlu1 %943  ;;  %v998_v37 = vmax.f32 %v990_v41, 0.0  ;;  %v999_v34 = vmax.f32 %v991_v54, 0.0 }
 0x205   : > { %v956_v26 = vmul.f32 %v944_v40, %v931_v20  ;;  %v957_v36 = vmul.f32 %v944_v40, %v935_v35 }
 0x206   : > { %v1006_v58 = vmin.f32 %v998_v37, 6.0  ;;  %v1007_v63 = vmin.f32 %v999_v34, 6.0 }
 0x207   : > { %v964_v57 = vadd.f32 %v956_v26, %v907_v46  ;;  %v965_v47 = vadd.f32 %v957_v36, %v908_v4 }
 0x209   : > { %v992_v38 = vadd.f32 %v978_v50, %v964_v57  ;;  %v993_v21 = vadd.f32 %v978_v50, %v965_v47 }
 0x20b   : > { %v1000_v43 = vmax.f32 %v992_v38, 0.0  ;;  %v1001_v44 = vmax.f32 %v993_v21, 0.0 }
 0x20d   : > { %v1008_v18 = vmin.f32 %v1000_v43, 6.0  ;;  %v1009_v0 = vmin.f32 %v1001_v44, 6.0  ;;  %v988_v45 = vpop.permute.xlu1 %987 }
 0x20e   : > { %v996_v31 = vadd.f32 %v988_v45, %v968_v17  ;;  %v997_v16 = vadd.f32 %v988_v45, %v969_v56 }
 0x20f   : > { %v1014_v2 = vpack.c.bf16 %v1008_v18, %v1006_v58  ;;  %v1015_v11 = vpack.c.bf16 %v1009_v0, %v1007_v63 }
 0x210   : > { %v1004_v42 = vmax.f32 %v996_v31, 0.0  ;;  %v1005_v60 = vmax.f32 %v997_v16, 0.0 }
 0x212   : > { %v1012_v33 = vmin.f32 %v1004_v42, 6.0  ;;  %v1013_v39 = vmin.f32 %v1005_v60, 6.0 }
 0x214   : > { %v1016_v32 = vpack.c.bf16 %v1012_v33, %v1010_v22  ;;  %v1017_v14 = vpack.c.bf16 %v1013_v39, %v1011_v9 }
 0x215   : > { %v1021_v3 = vpop.permute.xlu1 %1020 }
 0x216   : > { %1033 = vmatpush.bf16.msra.mxu2 %v1016_v32  ;;  %1046 = vmatpush.bf16.msra.mxu3 %v1017_v14 }
 0x21a   : > { %1034 = vmatpush.bf16.msra.mxu2 %v1014_v2  ;;  %1047 = vmatpush.bf16.msra.mxu3 %v1015_v11 }
 0x21d   : > { %1192 = vmatmul.msk.bf16.vlgmr.msra.gmra.mxu2 %vm1023_vm10, %v482_v1  ;;  %1193 = vmatmul.msk.bf16.vlgmr.msra.gmra.mxu3 %vm1023_vm10, %v482_v1 }
 0x2a0   : > { %v1036_v5 = vpop.f32.mrf.mxu2  ;;  %v1049_v23 = vpop.f32.mrf.mxu3 }
 0x2a1   : > { %v1037_v7 = vadd.f32 %v1036_v5, %v1021_v3  ;;  %v1050_v59 = vadd.f32 %v1049_v23, %v1021_v3 }
 0x2a3   : > { %v1053_v13 = vadd.f32 %v1323_v8, %v1037_v7  ;;  %v1054_v52 = vadd.f32 %v1324_v30, %v1050_v59 }
 0x2a5   : > { %1055 = vst [vmem:[%s335_s22] sm:$0xff] %v1053_v13 }
 0x2a6   : > { %1056 = vst [vmem:[%s335_s22 + $0x8] sm:$0xff] %v1054_v52 }
 0x2a7   : > { %1352 = shalt.err (!%p1349_p7)
}
 0x2a8   : > { %1202 = dma.vmem_to_hbm [thread:$0]  (%p1534_p3), %s1074_s25, 256, %s1076_s0, %s1058_s30   ;;  %v1038_v12 = vpop.f32.mrf.mxu2  ;;  %v1051_v6 = vpop.f32.mrf.mxu3 }
 0x2a9 PF: > { %p1208_p9 = scmp.ge.s32.totalorder %s1419_s12, 2  ;;  %s1087_s20 = sand.u32 1, %s1391_s27  }
 0x2aa   : > { %s1088_s21 = scalar_lea.sflag [#allocation3], %s1087_s20 }
 0x2ab   : > { %p1205_p10 = pnand %p1208_p9, %p1543_p8 }
 0x2ad   : > { %p1206_p11 = pneg %p1205_p10 }
 0x2af   : > { %1386 = dma.done.wait (%p1206_p11), %s1088_s21, 256  }
 0x2b0   : > { %1388 = vsyncadd (%p1206_p11), %s1088_s21, 4294967040  ;;  %s21_s12 = sadd.s32 1, %s1419_s12   ;;  %s2182_s9 = sld [smem:[#allocation5_spill]] }
 0x2b1   : > { %p18_p12 = scmp.ge.s32.totalorder %s21_s12, 6   ;;  %s2183_s0 = sld [smem:[#allocation6_spill]] }
 0x2b2   : > { %s2184_s11 = sld [smem:[#allocation7_spill]]  ;;  %s2185_s27 = smov %s1395_s28 }
 0x2b3   : > { %s2186_s28 = smov %s1399_s29  ;;  %s2187_s29 = smov %s1552_s23 }
 0x2b4   : > { %s2188_s30 = smov %s1411_s10  ;;  %20 = sbr.rel (!%p18_p12) target bundleno = 7 (0x7), region = 90 }
 0x2b7   : > { %s2189_s10 = smov %s2183_s0 }
 0x2b9   :  { %1094 = vsyncpa [#allocation3], 1 }
 0x2ba   :  { %1096 = vsyncpa [#allocation3 + $0x1], 1 }

// kernel: tpu_custom_call.1
= control target key start
LH: loop header
LB: loop body
LE: loop exit
PB: predicated region body
PF: predicated region fallthrough
CT: control target
= control target key end

     0   :  { %s2163_s0 = inlined_call_operand.vmem [shape: f32[2,2,8,256], index: 0, kind: input, shape index: {}]   ;;  %s2164_s1 = inlined_call_operand.vmem [shape: f32[2,1,256], index: 1, kind: input, shape index: {}]   ;;  %s2165_s2 = inlined_call_operand.vmem [shape: bf16[32,8], index: 2, kind: input, shape index: {}]   ;;  %s2166_s3 = inlined_call_operand.vmem [shape: f32[32,1], index: 3, kind: input, shape index: {}]   ;;  %s2167_s4 = inlined_call_operand.vmem [shape: f32[32,9], index: 4, kind: input, shape index: {}]   ;;  %s2168_s5 = inlined_call_operand.vmem [shape: f32[32,1], index: 5, kind: input, shape index: {}]   ;;  %s2169_s6 = inlined_call_operand.vmem [shape: bf16[8,32], index: 6, kind: input, shape index: {}]   ;;  %s2170_s7 = inlined_call_operand.vmem [shape: f32[8,1], index: 7, kind: input, shape index: {}]   ;;  %s2171_s8 = inlined_call_operand.hbm [shape: f32[2,2,8,256], index: 8, kind: output, shape index: {}]  }
   0x1   :  { %2175 = sst [smem:[#allocation8_spill]] %s2163_s0 }
   0x2   :  { %13 = vsyncpa [#allocation3], 0 }
   0x3   :  { %15 = vsyncpa [#allocation3 + $0x1], 0  ;;  %s1483_s27 = smov 0   ;;  %s1485_s28 = smov 0  }
   0x4   :  { %s1487_s29 = smov 0   ;;  %s1489_s30 = smov 0  }
   0x5   :  { %s1491_s9 = smov 0   ;;  %s1493_s10 = smov 0  }
   0x6   :  { %s1495_s11 = smov 0   ;;  %s1497_s12 = smov 0  }
   0x7 LB: > { %2176 = sst [smem:[#allocation5_spill]] %s1415_s11  ;;  %s1170_s13 = sadd.s32 4294967295, %s1419_s12   ;;  %s1419_s12 = sphi %s1497_s12, %s21_s12   ;;  %s1415_s11 = sphi %s1495_s11, %s2184_s11   ;;  %s1411_s10 = sphi %s1493_s10, %s2189_s10   ;;  %s1407_s9 = sphi %s1491_s9, %s2182_s9   ;;  %s1403_s30 = sphi %s1489_s30, %s2188_s30   ;;  %s1399_s29 = sphi %s1487_s29, %s2187_s29   ;;  %s1395_s28 = sphi %s1485_s28, %s2186_s28   ;;  %s1391_s27 = sphi %s1483_s27, %s2185_s27  }
   0x8   : > { %s1171_s14 = sadd.s32 4294967294, %s1419_s12   ;;  %s30_s15 = sadd.s32 1, %s1411_s10 }
   0x9   : > { %p31_p0 = scmp.ge.s32.totalorder %s30_s15, 2  ;;  %s33_s16 = sadd.s32 1, %s1415_s11 }
   0xa   : > { %p232_p1 = scmp.ne.s32.totalorder %s1399_s29, %s1395_s28  ;;  %p233_p2 = scmp.eq.s32.totalorder %s1170_s13, 3 }
   0xb   : > { %s2191_s15 = smov (%p31_p0, %s30_s15), 0  ;;  %s2193_s16 = smov (!%p31_p0, %s33_s16), %s1415_s11 }
   0xc   : > { %2177 = sst [smem:[#allocation6_spill]] %s2191_s15  ;;  %s218_s17 = ssub.s32 %s1411_s10, %s2191_s15 }
   0xd   : > { %p1534_p3 = por %p233_p2, %p232_p1  ;;  %p35_p4 = scmp.ge.s32.totalorder %s2193_s16, 2 }
   0xe   : > { %p238_p5 = scmp.ne.s32.totalorder %s1395_s28, %s1391_s27  ;;  %p239_p6 = scmp.eq.s32.totalorder %s1171_s14, 3 }
   0xf   : > { %p1174_p7 = scmp.ge.s32.totalorder %s1419_s12, 1  ;;  %s2195_s16 = smov (%p35_p4, %s2193_s16), 0 }
  0x10   : > { %2179 = sst [smem:[#allocation7_spill]] %s2195_s16  ;;  %p1543_p8 = por %p239_p6, %p238_p5 }
  0x11   : > { %p294_p9 = scmp.lt.s32.totalorder %s1419_s12, 5  ;;  %s217_s20 = ssub.s32 %s1415_s11, %s2195_s16 }
  0x12   : > { %s222_s21 = sadd.s32 1, %s1399_s29  ;;  %s219_s22 = sor.u32 %s218_s17, %s217_s20 }
  0x13   : > { %p295_p10 = pnand %p1174_p7, %p294_p9  ;;  %p220_p11 = scmp.eq.s32.totalorder %s219_s22, 0 }
  0x14   : > { %p336_p12 = scmp.lt.s32.totalorder (!%p295_p10), %s1407_s9, 1  ;;  %p338_p13 = scmp.lt.s32.totalorder (!%p295_p10), %s1403_s30, 1 }
  0x15   : > { %s1552_s23 = scalar_select %p220_p11, %s1399_s29, %s222_s21  }
  0x16   : > { %298 = sbr.rel (%p295_p10) target bundleno = 681 (0x2a9), region = 52  ;;  %s2181_s0 = sld [smem:[#allocation8_spill]] (!%p295_p10) }
  0x17   : > { %s1428_s11 = smov (!%p295_p10), 18   ;;  %s1429_s13 = smov (!%p295_p10), 1  }
  0x18   : > { %s1430_s14 = smov (!%p295_p10), 127   ;;  %s1432_s17 = smov (!%p295_p10), 111  }
  0x19   : > { %s1195_s15 = sshll.u32 (!%p295_p10), %s1403_s30, 1 }
  0x1b   : > { %v1557_v0 = vld [vmem:[%s2167_s4 + $0x10] sm:$0xff]  ;;  %v1421_v1 = vmov 4   ;;  %v1422_v2 = vmov 0   ;;  %s337_s26 = scalar_select %p336_p12, %s1407_s9, 1  ;;  %v1570_v4 = vld [vmem:[%s2167_s4] sm:$0xff]  ;;  %vm399_vm0 = vcmask 1043456  }
  0x1c   : > { %1292 = vset.pattern.permute.xlu0 %v1421_v1  ;;  %1290 = vset.pattern.permute.xlu1 %v1422_v2  ;;  %v360_v3 = vld [vmem:[%s2166_s3 + $0x10] sm:$0xff]  ;;  %s1573_s21 = scalar_select %p338_p13, %s1403_s30, 1  ;;  %v358_v5 = vld [vmem:[%s2166_s3] sm:$0xff]  ;;  %v361_v8 = vld [vmem:[%s2166_s3 + $0x18] sm:$0xff]  ;;  %vm392_vm1 = vcmask 64512   ;;  %v1423_v18 = vmov 1  }
  0x1d   : > { %496 = vperm.xlu0 %1292, %v1557_v0   ;;  %1291 = vset.pattern.permute.xlu2 %v1421_v1  ;;  %s1177_s22 = sshll.u32 %s337_s26, 2  ;;  %v1596_v11 = vld [vmem:[%s2167_s4 + $0x8] sm:$0xff]  ;;  %v1200_v14 = vld [vmem:[%s2165_s2] sm:$0xff]  ;;  %v1610_v16 = vld [vmem:[%s2167_s4 + $0x18] sm:$0xff]  ;;  %v1424_v19 = vmov 2   ;;  %v1425_v20 = vmov 3  }
  0x1e   : > { %374 = vperm.xlu1 %1290, %v360_v3   ;;  %486 = vperm.xlu2 %1291, %v1570_v4   ;;  %s1176_s24 = sshll.u32 %s1573_s21, 1  ;;  %v359_v15 = vld [vmem:[%s2166_s3 + $0x8] sm:$0xff]  ;;  %s1426_s21 = smov 17   ;;  %vm1023_vm10 = vcmask 261120  }
  0x1f   : > { %s342_s25 = sadd.s32 %s1177_s22, %s1176_s24  ;;  %v1201_v17 = vld [vmem:[%s2165_s2 + $0x8] sm:$0xff]  ;;  %s1434_s26 = smov 110  }
  0x20   : > { %s1178_s16 = sshll.u32 %s342_s25, 3  ;;  %s1435_s22 = smov 109  }
  0x21   : > { %s1585_s20 = scalar_lea.vmem %s2181_s0, %s1178_s16  ;;  %s348_s16 = scalar_lea.vmem %s2164_s1, %s1176_s24 }
  0x22   : > { %v350_v6 = vld [vmem:[%s1585_s20] sm:$0xff]  ;;  %v351_v7 = vld [vmem:[%s1585_s20 + $0x8] sm:$0xff]  ;;  %s1427_s24 = smov 19  }
  0x23   : > { %v356_v9 = vpack.c.bf16 %v350_v6, %v350_v6  ;;  %v357_v10 = vpack.c.bf16 %v351_v7, %v351_v7  ;;  %v460_v23 = vld [vmem:[%s348_s16] sm:$0x3]  ;;  %s1196_s16 = sshll.u32 %s1407_s9, 2 }
  0x24   : > { %v1643_v28 = vperm.slane %v460_v23, 0  ;;  %v1645_v29 = vperm.slane %v460_v23, 1 }
  0x25   : > { %1293 = vset.pattern.permute.xlu0 %v1422_v2  ;;  %v401_v12 = vsel %vm399_vm0, %v356_v9, 0  ;;  %v404_v13 = vsel %vm399_vm0, %v357_v10, 0  ;;  %v1431_v9 = vmov 5  }
  0x26   : > { %364 = vperm.xlu0 %1293, %v358_v5   ;;  %491 = vperm.xlu2 %1291, %v1596_v11  }
  0x27   : > { %379 = vperm.xlu1 %1290, %v361_v8   ;;  %413 = vmatpush.bf16.msra.mxu0 %v401_v12 }
  0x28   : > { %432 = vmatpush.bf16.msra.mxu1 %v404_v13 }
  0x2a   : > { %1188 = vmatmul.msk.bf16.vlgmr.msra.gmra.mxu0 %vm392_vm1, %v1200_v14 }
  0x2b   : > { %1190 = vmatmul.msk.bf16.vlgmr.msra.gmra.mxu1 %vm392_vm1, %v1200_v14 }
  0x2e   : > { %369 = vperm.xlu0 %1293, %v359_v15   ;;  %1295 = vset.pattern.permute.xlu2 %v1422_v2 }
  0x2f   : > { %1294 = vset.pattern.permute.xlu1 %v1421_v1  ;;  %540 = vperm.xlu2 %1295, %v1570_v4  }
  0x30   : > { %501 = vperm.xlu1 %1294, %v1610_v16  }
  0x36   : > { %544 = vperm.xlu0 %1293, %v1596_v11  }
  0x37   : > { %552 = vperm.xlu2 %1295, %v1610_v16  }
  0x38   : > { %1296 = vset.pattern.permute.xlu1 %v1422_v2 }
  0x39   : > { %548 = vperm.xlu1 %1296, %v1557_v0  }
  0x3a   : > { %1189 = vmatmul.msk.bf16.gmra.mxu0 %vm392_vm1, %v1201_v17 }
  0x3b   : > { %1191 = vmatmul.msk.bf16.gmra.mxu1 %vm392_vm1, %v1201_v17 }
  0x3e   : > { %1297 = vset.pattern.permute.xlu0 %v1423_v18 }
  0x3f   : > { %1299 = vset.pattern.permute.xlu2 %v1423_v18  ;;  %597 = vperm.xlu0 %1297, %v1570_v4  }
  0x40   : > { %605 = vperm.xlu2 %1299, %v1557_v0  }
  0x41   : > { %1298 = vset.pattern.permute.xlu1 %v1423_v18 }
  0x42   : > { %601 = vperm.xlu1 %1298, %v1596_v11  }
  0x47   : > { %1302 = vset.pattern.permute.xlu0 %v1424_v19 }
  0x48   : > { %1301 = vset.pattern.permute.xlu2 %v1424_v19  ;;  %662 = vperm.xlu0 %1302, %v1557_v0  }
  0x49   : > { %658 = vperm.xlu2 %1301, %v1596_v11  }
  0x4a   : > { %609 = vperm.xlu1 %1298, %v1610_v16  }
  0x50   : > { %1304 = vset.pattern.permute.xlu0 %v1425_v20 }
  0x51   : > { %1303 = vset.pattern.permute.xlu2 %v1425_v20  ;;  %715 = vperm.xlu0 %1304, %v1596_v11  }
  0x52   : > { %1300 = vset.pattern.permute.xlu1 %v1424_v19  ;;  %711 = vperm.xlu2 %1303, %v1570_v4  }
  0x53   : > { %654 = vperm.xlu1 %1300, %v1570_v4  }
  0x59   : > { %1306 = vset.pattern.permute.xlu0 %v1431_v9 }
  0x5a   : > { %723 = vperm.xlu2 %1303, %v1610_v16  }
  0x5b   : > { %666 = vperm.xlu1 %1300, %v1610_v16  }
  0x63   : > { %1305 = vset.pattern.permute.xlu1 %v1425_v20 }
  0x64   : > { %719 = vperm.xlu1 %1305, %v1557_v0  }
  0x6c   : > { %1307 = vset.pattern.permute.xlu1 %v1431_v9 }
  0x78   : > { %v1668_v49 = vpop.permute.xlu2 %486 }
  0x80   : > { %v1682_v57 = vpop.permute.xlu2 %491 }
  0x89   : > { %v1693_v60 = vpop.permute.xlu2 %540 }
  0x8f   : > { %v1636_v21 = vpop.permute.xlu0 %496 }
  0x90   : > { %v375_v45 = vpop.permute.xlu1 %374 }
  0x91   : > { %v1707_v63 = vpop.permute.xlu2 %552 }
  0x98   : > { %v365_v22 = vpop.permute.xlu0 %364 }
  0x99   : > { %v380_v61 = vpop.permute.xlu1 %379 }
  0x9a   : > { %v1719_v10 = vpop.permute.xlu2 %605 }
  0xa0   : > { %v370_v34 = vpop.permute.xlu0 %369 }
  0xa2   : > { %v1711_v6 = vpop.permute.xlu1 %501 }
  0xa3   : > { %v1732_v17 = vpop.permute.xlu2 %658 }
  0xa7   : > { %v415_v24 = vpop.f32.mrf.mxu0 }
  0xa8   : > { %v434_v25 = vpop.f32.mrf.mxu1  ;;  %v416_v26 = vadd.f32 %v415_v24, %v365_v22 }
  0xa9   : > { %v435_v27 = vadd.f32 %v434_v25, %v365_v22  ;;  %v1753_v22 = vpop.permute.xlu0 %544 }
  0xaa   : > { %v444_v30 = vmax.f32 %v416_v26, 0.0 }
  0xab   : > { %v445_v31 = vmax.f32 %v435_v27, 0.0  ;;  %v1726_v14 = vpop.permute.xlu1 %548 }
  0xac   : > { %v452_v32 = vmin.f32 %v444_v30, 6.0  ;;  %v1745_v20 = vpop.permute.xlu2 %711 }
  0xad   : > { %v453_v33 = vmin.f32 %v445_v31, 6.0 }
  0xae   : > { %v1648_v35 = vmul.f32 %v1643_v28, %v452_v32 }
  0xaf   : > { %v1651_v36 = vmul.f32 %v1645_v29, %v453_v33  ;;  %v417_v37 = vpop.f32.mrf.mxu0  ;;  %v528_v33 = vlaneseq }
  0xb0   : > { %v436_v38 = vpop.f32.mrf.mxu1  ;;  %512 = vrot.lane.b32.xlu2 %v1648_v35, %s1427_s24  ;;  %v418_v40 = vadd.f32 %v417_v37, %v370_v34 }
  0xb1   : > { %v437_v39 = vadd.f32 %v436_v38, %v370_v34  ;;  %636 = vrot.lane.b32.xlu0 %v1651_v36, %s1426_s21  ;;  %520 = vrot.lane.b32.xlu1 %v1651_v36, %s1427_s24  ;;  %v598_v25 = vpop.permute.xlu0 %597  ;;  %v1792_v38 = vand.u32 127, %v528_v33 }
  0xb2   : > { %v446_v43 = vmax.f32 %v418_v40, 0.0 }
  0xb3   : > { %v447_v41 = vmax.f32 %v437_v39, 0.0  ;;  %vm644_vm2 = vcmp.lt.s32.totalorder %v1792_v38, 17  ;;  %vm530_vm3 = vcmp.lt.s32.totalorder %v1792_v38, 19  ;;  %vm587_vm4 = vcmp.lt.s32.totalorder %v1792_v38, 18 }
  0xb4   : > { %v454_v47 = vmin.f32 %v446_v43, 6.0  ;;  %v1743_v19 = vpop.permute.xlu1 %601  ;;  %v1763_v24 = vpop.permute.xlu2 %723  ;;  %vm701_vm5 = vcmp.lt.s32.totalorder %v1792_v38, 1  ;;  %vm758_vm6 = vcmp.lt.s32.totalorder %v1792_v38, 127  ;;  %vm815_vm7 = vcmp.lt.s32.totalorder %v1792_v38, 111 }
  0xb5   : > { %v455_v42 = vmin.f32 %v447_v41, 6.0  ;;  %vm872_vm8 = vcmp.lt.s32.totalorder %v1792_v38, 110  ;;  %vm929_vm9 = vcmp.lt.s32.totalorder %v1792_v38, 109 }
  0xb6   : > { %v1671_v50 = vmul.f32 %v1643_v28, %v454_v47 }
  0xb7   : > { %v1660_v44 = vmul.f32 %v1645_v29, %v455_v42  ;;  %v420_v52 = vpop.f32.mrf.mxu0 }
  0xb8   : > { %v439_v46 = vpop.f32.mrf.mxu1  ;;  %579 = vrot.lane.b32.xlu2 %v1651_v36, %s1428_s11  ;;  %v421_v53 = vadd.f32 %v420_v52, %v375_v45  ;;  %v505_v52 = vmul.f32 %v1668_v49, %v1651_v36 }
  0xb9   : > { %581 = vrot.lane.b32.xlu0 %v1660_v44, %s1428_s11  ;;  %571 = vrot.lane.b32.xlu1 %v1648_v35, %s1428_s11  ;;  %v440_v48 = vadd.f32 %v439_v46, %v375_v45 }
  0xba   : > { %v448_v55 = vmax.f32 %v421_v53, 0.0 }
  0xbb   : > { %v449_v51 = vmax.f32 %v440_v48, 0.0 }
  0xbc   : > { %v456_v58 = vmin.f32 %v448_v55, 6.0  ;;  %v1755_v23 = vpop.permute.xlu1 %609 }
  0xbd   : > { %v457_v54 = vmin.f32 %v449_v51, 6.0  ;;  %v504_v51 = vmul.f32 %v1668_v49, %v1648_v35 }
  0xbe   : > { %v1691_v59 = vmul.f32 %v1643_v28, %v456_v58 }
  0xbf   : > { %v1680_v56 = vmul.f32 %v1645_v29, %v457_v54  ;;  %v422_v62 = vpop.f32.mrf.mxu0 }
  0xc0   : > { %628 = vrot.lane.b32.xlu2 %v1648_v35, %s1426_s21  ;;  %v423_v1 = vadd.f32 %v422_v62, %v380_v61  ;;  %v441_v5 = vpop.f32.mrf.mxu1 }
  0xc1   : > { %630 = vrot.lane.b32.xlu0 %v1671_v50, %s1426_s21  ;;  %693 = vrot.lane.b32.xlu1 %v1651_v36, %s1429_s13  ;;  %v442_v8 = vadd.f32 %v441_v5, %v380_v61 }
  0xc2   : > { %v450_v3 = vmax.f32 %v423_v1, 0.0 }
  0xc3   : > { %v451_v13 = vmax.f32 %v442_v8, 0.0 }
  0xc4   : > { %v458_v7 = vmin.f32 %v450_v3, 6.0 }
  0xc5   : > { %v459_v15 = vmin.f32 %v451_v13, 6.0  ;;  %v655_v26 = vpop.permute.xlu1 %654 }
  0xc6   : > { %v1722_v12 = vmul.f32 %v1643_v28, %v458_v7  ;;  %v1770_v28 = vpop.permute.xlu0 %662 }
  0xc7   : > { %v1735_v18 = vmul.f32 %v1645_v29, %v459_v15  ;;  %v1433_v29 = vmov 6  }
  0xc8   : > { %685 = vrot.lane.b32.xlu2 %v1648_v35, %s1429_s13 }
  0xc9   : > { %524 = vrot.lane.b32.xlu0 %v1680_v56, %s1427_s24  ;;  %742 = vrot.lane.b32.xlu1 %v1648_v35, %s1430_s14 }
  0xca   : > { %1309 = vset.pattern.permute.xlu2 %v1433_v29 }
  0xcd   : > { %v1775_v30 = vpop.permute.xlu1 %666 }
  0xce   : > { %v1784_v32 = vpop.permute.xlu0 %715 }
  0xd0   : > { %750 = vrot.lane.b32.xlu2 %v1651_v36, %s1430_s14 }
  0xd1   : > { %575 = vrot.lane.b32.xlu0 %v1691_v59, %s1428_s11  ;;  %514 = vrot.lane.b32.xlu1 %v1671_v50, %s1427_s24 }
  0xd6   : > { %v1790_v34 = vpop.permute.xlu1 %719 }
  0xd8   : > { %522 = vrot.lane.b32.xlu2 %v1660_v44, %s1427_s24 }
  0xd9   : > { %697 = vrot.lane.b32.xlu0 %v1680_v56, %s1429_s13  ;;  %638 = vrot.lane.b32.xlu1 %v1660_v44, %s1426_s21 }
  0xe0   : > { %573 = vrot.lane.b32.xlu2 %v1671_v50, %s1428_s11 }
  0xe1   : > { %746 = vrot.lane.b32.xlu0 %v1691_v59, %s1430_s14  ;;  %687 = vrot.lane.b32.xlu1 %v1671_v50, %s1429_s13 }
  0xe8   : > { %695 = vrot.lane.b32.xlu2 %v1660_v44, %s1429_s13 }
  0xe9   : > { %518 = vrot.lane.b32.xlu0 %v1722_v12, %s1427_s24  ;;  %583 = vrot.lane.b32.xlu1 %v1680_v56, %s1428_s11 }
  0xf0   : > { %744 = vrot.lane.b32.xlu2 %v1671_v50, %s1430_s14 }
  0xf1   : > { %642 = vrot.lane.b32.xlu0 %v1735_v18, %s1426_s21  ;;  %632 = vrot.lane.b32.xlu1 %v1691_v59, %s1426_s21 }
  0xf8   : > { %516 = vrot.lane.b32.xlu2 %v1691_v59, %s1427_s24 }
  0xf9   : > { %691 = vrot.lane.b32.xlu0 %v1722_v12, %s1429_s13  ;;  %526 = vrot.lane.b32.xlu1 %v1735_v18, %s1427_s24  ;;  %s1069_s24 = sadd.s32 %s1196_s16, %s1195_s15 }
 0x100   : > { %640 = vrot.lane.b32.xlu2 %v1680_v56, %s1426_s21 }
 0x101   : > { %752 = vrot.lane.b32.xlu0 %v1660_v44, %s1430_s14  ;;  %577 = vrot.lane.b32.xlu1 %v1722_v12, %s1428_s11 }
 0x108   : > { %689 = vrot.lane.b32.xlu2 %v1691_v59, %s1429_s13 }
 0x109   : > { %776 = vperm.xlu0 %1306, %v1557_v0   ;;  %699 = vrot.lane.b32.xlu1 %v1735_v18, %s1429_s13  ;;  %s1197_s13 = sshll.u32 %s1069_s24, 3 }
 0x10a   : > { %v513_v27 = vpop.permute.xlu2 %512 }
 0x110   : > { %585 = vrot.lane.b32.xlu2 %v1735_v18, %s1428_s11 }
 0x111   : > { %813 = vrot.lane.b32.xlu0 %v1735_v18, %s1432_s17  ;;  %748 = vrot.lane.b32.xlu1 %v1722_v12, %s1430_s14 }
 0x112   : > { %1314 = vset.pattern.permute.xlu0 %v1433_v29  ;;  %v580_v31 = vpop.permute.xlu2 %579 }
 0x118   : > { %634 = vrot.lane.b32.xlu2 %v1722_v12, %s1426_s21  ;;  %s333_s21 = sand.u32 1, %s1395_s28  }
 0x119   : > { %860 = vrot.lane.b32.xlu0 %v1691_v59, %s1434_s26  ;;  %754 = vrot.lane.b32.xlu1 %v1680_v56, %s1430_s14  ;;  %s1175_s11 = sshll.u32 %s333_s21, 4  ;;  %s1058_s30 = scalar_lea.sflag [#allocation3], %s333_s21 }
 0x11a   : > { %v629_v37 = vpop.permute.xlu2 %628 }
 0x120   : > { %756 = vrot.lane.b32.xlu2 %v1735_v18, %s1430_s14 }
 0x121   : > { %870 = vrot.lane.b32.xlu0 %v1735_v18, %s1434_s26  ;;  %780 = vperm.xlu1 %1307, %v1610_v16  }
 0x122   : > { %v686_v43 = vpop.permute.xlu2 %685 }
 0x123   : > { %v637_v39 = vpop.permute.xlu0 %636  ;;  %v521_v42 = vpop.permute.xlu1 %520 }
 0x124   : > { %v645_v40 = vsel %vm644_vm2, %v629_v37, %v637_v39  ;;  %v649_v41 = vsel %vm644_vm2, %v637_v39, %v629_v37  ;;  %v531_v47 = vsel %vm530_vm3, %v513_v27, %v521_v42  ;;  %v535_v48 = vsel %vm530_vm3, %v521_v42, %v513_v27 }
 0x125   : > { %v669_v45 = vmul.f32 %v655_v26, %v649_v41  ;;  %v670_v46 = vmul.f32 %v655_v26, %v645_v40  ;;  %v555_v53 = vmul.f32 %v1693_v60, %v535_v48  ;;  %v556_v54 = vmul.f32 %v1693_v60, %v531_v47 }
 0x127   : > { %v563_v55 = vadd.f32 %v555_v53, %v504_v51  ;;  %v564_v58 = vadd.f32 %v556_v54, %v505_v52  ;;  %v1436_v51 = vmov 7  }
 0x128   : > { %803 = vrot.lane.b32.xlu2 %v1691_v59, %s1432_s17 }
 0x129   : > { %809 = vrot.lane.b32.xlu0 %v1660_v44, %s1432_s17  ;;  %805 = vrot.lane.b32.xlu1 %v1722_v12, %s1432_s17 }
 0x12a   : > { %1308 = vset.pattern.permute.xlu1 %v1433_v29  ;;  %v751_v62 = vpop.permute.xlu2 %750 }
 0x12b   : > { %v582_v61 = vpop.permute.xlu0 %581  ;;  %v572_v49 = vpop.permute.xlu1 %571 }
 0x12c   : > { %v588_v60 = vsel %vm587_vm4, %v572_v49, %v580_v31  ;;  %v592_v1 = vsel %vm587_vm4, %v580_v31, %v572_v49  ;;  %v507_v49 = vmul.f32 %v1682_v57, %v1660_v44 }
 0x12d   : > { %v612_v3 = vmul.f32 %v598_v25, %v592_v1  ;;  %v613_v5 = vmul.f32 %v598_v25, %v588_v60 }
 0x12f   : > { %v620_v7 = vadd.f32 %v612_v3, %v563_v55  ;;  %v621_v8 = vadd.f32 %v613_v5, %v564_v58 }
 0x130   : > { %811 = vrot.lane.b32.xlu2 %v1680_v56, %s1432_s17 }
 0x131   : > { %925 = vrot.lane.b32.xlu0 %v1680_v56, %s1435_s22  ;;  %833 = vperm.xlu1 %1308, %v1557_v0   ;;  %v677_v13 = vadd.f32 %v669_v45, %v620_v7  ;;  %v678_v15 = vadd.f32 %v670_v46, %v621_v8 }
 0x132   : > { %v523_v31 = vpop.permute.xlu2 %522 }
 0x133   : > { %v631_v26 = vpop.permute.xlu0 %630  ;;  %v694_v27 = vpop.permute.xlu1 %693 }
 0x134   : > { %v702_v25 = vsel %vm701_vm5, %v686_v43, %v694_v27  ;;  %v706_v33 = vsel %vm701_vm5, %v694_v27, %v686_v43 }
 0x135   : > { %v726_v37 = vmul.f32 %v1745_v20, %v706_v33  ;;  %v727_v39 = vmul.f32 %v1745_v20, %v702_v25 }
 0x137   : > { %v1839_v40 = vadd.f32 %v726_v37, %v677_v13  ;;  %v1841_v41 = vadd.f32 %v727_v39, %v678_v15 }
 0x138   : > { %837 = vperm.xlu2 %1309, %v1610_v16  }
 0x139   : > { %829 = vperm.xlu0 %1314, %v1596_v11   ;;  %862 = vrot.lane.b32.xlu1 %v1722_v12, %s1434_s26 }
 0x13a   : > { %1310 = vset.pattern.permute.xlu1 %v1431_v9  ;;  %v574_v45 = vpop.permute.xlu2 %573 }
 0x13b   : > { %v525_v42 = vpop.permute.xlu0 %524  ;;  %v743_v43 = vpop.permute.xlu1 %742  ;;  %v589_v47 = vsel %vm587_vm4, %v574_v45, %v582_v61  ;;  %v593_v48 = vsel %vm587_vm4, %v582_v61, %v574_v45  ;;  %v506_v61 = vmul.f32 %v1682_v57, %v1671_v50  ;;  %v1437_v45 = vmov 8  }
 0x13c   : > { %v1851_v20 = vsel %vm758_vm6, %v743_v43, %v751_v62  ;;  %v1855_v46 = vsel %vm758_vm6, %v751_v62, %v743_v43  ;;  %v615_v1 = vmul.f32 %v1743_v19, %v589_v47  ;;  %v509_v43 = vmul.f32 %v1636_v21, %v1680_v56 }
 0x140   : > { %868 = vrot.lane.b32.xlu2 %v1680_v56, %s1434_s26 }
 0x141   : > { %1315 = vset.pattern.permute.xlu0 %v1436_v51  ;;  %768 = vperm.xlu1 %1310, %v1570_v4  }
 0x142   : > { %890 = vperm.xlu0 %1315, %v1557_v0   ;;  %1311 = vset.pattern.permute.xlu2 %v1431_v9  ;;  %v696_v54 = vpop.permute.xlu2 %695  ;;  %v614_v9 = vmul.f32 %v1743_v19, %v593_v48 }
 0x143   : > { %v576_v52 = vpop.permute.xlu0 %575  ;;  %v515_v53 = vpop.permute.xlu1 %514 }
 0x144   : > { %v532_v55 = vsel %vm530_vm3, %v515_v53, %v523_v31  ;;  %v536_v58 = vsel %vm530_vm3, %v523_v31, %v515_v53 }
 0x145   : > { %v557_v62 = vmul.f32 %v1753_v22, %v536_v58  ;;  %v558_v60 = vmul.f32 %v1753_v22, %v532_v55 }
 0x147   : > { %v565_v3 = vadd.f32 %v557_v62, %v506_v61  ;;  %v566_v5 = vadd.f32 %v558_v60, %v507_v49 }
 0x148   : > { %772 = vperm.xlu2 %1311, %v1596_v11  }
 0x149   : > { %1312 = vset.pattern.permute.xlu1 %v1436_v51  ;;  %v622_v7 = vadd.f32 %v614_v9, %v565_v3  ;;  %v623_v8 = vadd.f32 %v615_v1, %v566_v5 }
 0x14a   : > { %864 = vrot.lane.b32.xlu0 %v1651_v36, %s1434_s26  ;;  %894 = vperm.xlu1 %1312, %v1610_v16   ;;  %v1884_v22 = vpop.permute.xlu2 %744 }
 0x14b   : > { %v698_v57 = vpop.permute.xlu0 %697  ;;  %v639_v13 = vpop.permute.xlu1 %638 }
 0x14c   : > { %v646_v19 = vsel %vm644_vm2, %v631_v26, %v639_v13  ;;  %v650_v15 = vsel %vm644_vm2, %v639_v13, %v631_v26  ;;  %v508_v26 = vmul.f32 %v1636_v21, %v1691_v59 }
 0x14d   : > { %v671_v27 = vmul.f32 %v1732_v17, %v650_v15  ;;  %v672_v31 = vmul.f32 %v1732_v17, %v646_v19 }
 0x14f   : > { %v679_v25 = vadd.f32 %v671_v27, %v622_v7  ;;  %v680_v33 = vadd.f32 %v672_v31, %v623_v8 }
 0x150   : > { %799 = vrot.lane.b32.xlu2 %v1648_v35, %s1432_s17 }
 0x151   : > { %1313 = vset.pattern.permute.xlu2 %v1433_v29 }
 0x152   : > { %801 = vrot.lane.b32.xlu1 %v1671_v50, %s1432_s17  ;;  %v517_v17 = vpop.permute.xlu2 %516  ;;  %886 = vperm.xlu0 %1315, %v1596_v11  }
 0x153   : > { %v1896_v37 = vpop.permute.xlu0 %746  ;;  %v688_v39 = vpop.permute.xlu1 %687  ;;  %1316 = vset.pattern.permute.xlu1 %v1437_v45  ;;  %v533_v29 = vsel %vm530_vm3, %v517_v17, %v525_v42  ;;  %v537_v53 = vsel %vm530_vm3, %v525_v42, %v517_v17 }
 0x154   : > { %v703_v47 = vsel %vm701_vm5, %v688_v39, %v696_v54  ;;  %v707_v48 = vsel %vm701_vm5, %v696_v54, %v688_v39  ;;  %v559_v56 = vmul.f32 %v1726_v14, %v537_v53  ;;  %v560_v58 = vmul.f32 %v1726_v14, %v533_v29 }
 0x155   : > { %v728_v55 = vmul.f32 %v1784_v32, %v707_v48  ;;  %v729_v21 = vmul.f32 %v1784_v32, %v703_v47  ;;  %v511_v53 = vmul.f32 %v1711_v6, %v1735_v18 }
 0x156   : > { %v567_v62 = vadd.f32 %v559_v56, %v508_v26  ;;  %v568_v54 = vadd.f32 %v560_v58, %v509_v43 }
 0x157   : > { %v1916_v61 = vadd.f32 %v728_v55, %v679_v25  ;;  %v1918_v49 = vadd.f32 %v729_v21, %v680_v33 }
 0x158   : > { %807 = vrot.lane.b32.xlu2 %v1651_v36, %s1432_s17 }
 0x15a   : > { %917 = vrot.lane.b32.xlu1 %v1691_v59, %s1435_s22  ;;  %v641_v9 = vpop.permute.xlu2 %640  ;;  %1319 = vset.pattern.permute.xlu0 %v1437_v45 }
 0x15b   : > { %v519_v42 = vpop.permute.xlu0 %518  ;;  %v584_v60 = vpop.permute.xlu1 %583  ;;  %939 = vperm.xlu0 %1319, %v1570_v4  }
 0x15c   : > { %v590_v32 = vsel %vm587_vm4, %v576_v52, %v584_v60  ;;  %v594_v14 = vsel %vm587_vm4, %v584_v60, %v576_v52 }
 0x15d   : > { %v616_v1 = vmul.f32 %v1719_v10, %v594_v14  ;;  %v617_v3 = vmul.f32 %v1719_v10, %v590_v32 }
 0x15f   : > { %v624_v5 = vadd.f32 %v616_v1, %v567_v62  ;;  %v625_v7 = vadd.f32 %v617_v3, %v568_v54 }
 0x160   : > { %919 = vrot.lane.b32.xlu2 %v1722_v12, %s1435_s22 }
 0x162   : > { %927 = vrot.lane.b32.xlu1 %v1735_v18, %s1435_s22  ;;  %v690_v13 = vpop.permute.xlu2 %689 }
 0x163   : > { %v643_v59 = vpop.permute.xlu0 %642  ;;  %v633_v8 = vpop.permute.xlu1 %632  ;;  %v704_v10 = vsel %vm701_vm5, %v690_v13, %v698_v57  ;;  %v708_v15 = vsel %vm701_vm5, %v698_v57, %v690_v13  ;;  %1322 = vset.pattern.permute.xlu0 %v1422_v2 }
 0x164   : > { %v647_v52 = vsel %vm644_vm2, %v633_v8, %v641_v9  ;;  %v651_v19 = vsel %vm644_vm2, %v641_v9, %v633_v8  ;;  %v730_v39 = vmul.f32 %v1790_v34, %v708_v15  ;;  %v731_v26 = vmul.f32 %v1790_v34, %v704_v10 }
 0x165   : > { %v673_v27 = vmul.f32 %v1770_v28, %v651_v19  ;;  %v674_v31 = vmul.f32 %v1770_v28, %v647_v52  ;;  %v510_v34 = vmul.f32 %v1711_v6, %v1722_v12 }
 0x167   : > { %v681_v25 = vadd.f32 %v673_v27, %v624_v5  ;;  %v682_v33 = vadd.f32 %v674_v31, %v625_v7 }
 0x168   : > { %825 = vperm.xlu2 %1313, %v1570_v4  }
 0x169   : > { %v1948_v43 = vadd.f32 %v730_v39, %v681_v25  ;;  %v1950_v17 = vadd.f32 %v731_v26, %v682_v33 }
 0x16a   : > { %947 = vperm.xlu1 %1316, %v1557_v0   ;;  %v586_v48 = vpop.permute.xlu2 %585 }
 0x16b   : > { %v692_v57 = vpop.permute.xlu0 %691  ;;  %v527_v47 = vpop.permute.xlu1 %526 }
 0x16c   : > { %v534_v28 = vsel %vm530_vm3, %v519_v42, %v527_v47  ;;  %v538_v29 = vsel %vm530_vm3, %v527_v47, %v519_v42 }
 0x16d   : > { %v561_v55 = vmul.f32 %v1707_v63, %v538_v29  ;;  %v562_v21 = vmul.f32 %v1707_v63, %v534_v28 }
 0x16f   : > { %v569_v0 = vadd.f32 %v561_v55, %v510_v34  ;;  %v570_v56 = vadd.f32 %v562_v21, %v511_v53 }
 0x170   : > { %1317 = vset.pattern.permute.xlu2 %v1437_v45 }
 0x171   : > { %951 = vperm.xlu2 %1317, %v1610_v16  }
 0x172   : > { %856 = vrot.lane.b32.xlu1 %v1648_v35, %s1434_s26  ;;  %v635_v18 = vpop.permute.xlu2 %634 }
 0x173   : > { %v753_v58 = vpop.permute.xlu0 %752  ;;  %v578_v63 = vpop.permute.xlu1 %577  ;;  %v648_v16 = vsel %vm644_vm2, %v635_v18, %v643_v59  ;;  %v652_v54 = vsel %vm644_vm2, %v643_v59, %v635_v18 }
 0x174   : > { %v1970_v12 = vsel %vm758_vm6, %v1884_v22, %v753_v58  ;;  %v1975_v6 = vsel %vm758_vm6, %v753_v58, %v1884_v22  ;;  %v591_v45 = vsel %vm587_vm4, %v578_v63, %v586_v48  ;;  %v595_v62 = vsel %vm587_vm4, %v586_v48, %v578_v63  ;;  %v479_v22 = vld [vmem:[%s2168_s5 + $0x8] sm:$0xff] }
 0x175   : > { %v618_v42 = vmul.f32 %v1755_v23, %v595_v62  ;;  %v619_v60 = vmul.f32 %v1755_v23, %v591_v45  ;;  %977 = vperm.xlu0 %1322, %v479_v22   ;;  %v675_v14 = vmul.f32 %v1775_v30, %v652_v54  ;;  %v676_v1 = vmul.f32 %v1775_v30, %v648_v16  ;;  %v478_v16 = vld [vmem:[%s2168_s5] sm:$0xff] }
 0x177   : > { %v626_v9 = vadd.f32 %v618_v42, %v569_v0  ;;  %v627_v32 = vadd.f32 %v619_v60, %v570_v56  ;;  %v480_v0 = vld [vmem:[%s2168_s5 + $0x10] sm:$0xff] }
 0x179   : > { %v683_v3 = vadd.f32 %v675_v14, %v626_v9  ;;  %v684_v5 = vadd.f32 %v676_v1, %v627_v32  ;;  %858 = vrot.lane.b32.xlu2 %v1671_v50, %s1434_s26 }
 0x17a   : > { %866 = vrot.lane.b32.xlu1 %v1660_v44, %s1434_s26  ;;  %v757_v59 = vpop.permute.xlu2 %756  ;;  %1318 = vset.pattern.permute.xlu2 %v1436_v51  ;;  %s1071_s26 = scalar_lea.hbm %s2171_s8, %s1197_s13 }
 0x17b   : > { %v777_v23 = vpop.permute.xlu0 %776  ;;  %v700_v7 = vpop.permute.xlu1 %699  ;;  %s1075_s0 = sshll.u32 %s1071_s26, 4  ;;  %s1076_s0 = int_to_ptr.hbm [resolvable:$true] %s1075_s0 }
 0x17c   : > { %v705_v8 = vsel %vm701_vm5, %v692_v57, %v700_v7  ;;  %v709_v13 = vsel %vm701_vm5, %v700_v7, %v692_v57  ;;  %s1339_s9 = sshra.s32 %s1076_s0, 4  ;;  %s1340_s9 = int_to_ptr.hbm [resolvable:$true] %s1339_s9 }
 0x17d   : > { %v732_v30 = vmul.f32 %v1763_v24, %v709_v13  ;;  %v733_v52 = vmul.f32 %v1763_v24, %v705_v8  ;;  %s1341_s15 = scalar_lea.hbm %s1340_s9, 16  ;;  %p1346_p4 = scmp.lt.s32.totalorder %s1340_s9, %s2171_s8 }
 0x17e   : > { %p1342_p0 = scmp.ne.s32.totalorder %s1340_s9, %s1341_s15 }
 0x17f   : > { %v740_v19 = vadd.f32 %v732_v30, %v683_v3  ;;  %v741_v10 = vadd.f32 %v733_v52, %v684_v5 }
 0x180   : > { %p1343_p1 = pnand %p1342_p0, %p1534_p3 }
 0x181   : > { %882 = vperm.xlu2 %1318, %v1570_v4  }
 0x182   : > { %913 = vrot.lane.b32.xlu1 %v1648_v35, %s1435_s22  ;;  %v804_v51 = vpop.permute.xlu2 %803  ;;  %p1344_p2 = pneg %p1343_p1 }
 0x183   : > { %v814_v15 = vpop.permute.xlu0 %813  ;;  %v749_v27 = vpop.permute.xlu1 %748 }
 0x184   : > { %v762_v31 = vsel %vm758_vm6, %v749_v27, %v757_v59  ;;  %v766_v25 = vsel %vm758_vm6, %v757_v59, %v749_v27 }
 0x189   : > { %915 = vrot.lane.b32.xlu2 %v1671_v50, %s1435_s22 }
 0x18a   : > { %921 = vrot.lane.b32.xlu1 %v1651_v36, %s1435_s22  ;;  %v812_v4 = vpop.permute.xlu2 %811  ;;  %1320 = vset.pattern.permute.xlu2 %v1422_v2 }
 0x18b   : > { %v861_v35 = vpop.permute.xlu0 %860  ;;  %v755_v24 = vpop.permute.xlu1 %754  ;;  %v818_v26 = vsel %vm815_vm7, %v804_v51, %v812_v4  ;;  %v822_v36 = vsel %vm815_vm7, %v812_v4, %v804_v51 }
 0x18c   : > { %v761_v33 = vsel %vm758_vm6, %v1896_v37, %v755_v24  ;;  %v765_v39 = vsel %vm758_vm6, %v755_v24, %v1896_v37 }
 0x18d   : > { %v787_v50 = vmul.f32 %v777_v23, %v761_v33  ;;  %v788_v57 = vmul.f32 %v777_v23, %v765_v39 }
 0x18f   : > { %v795_v47 = vadd.f32 %v787_v50, %v1948_v43  ;;  %v796_v48 = vadd.f32 %v788_v57, %v1950_v17  ;;  %v481_v43 = vld [vmem:[%s2168_s5 + $0x18] sm:$0xff] }
 0x191   : > { %923 = vrot.lane.b32.xlu2 %v1660_v44, %s1435_s22  ;;  %s335_s22 = scalar_lea.vmem [#allocation2], %s1175_s11  ;;  %s1345_s11 = scalar_lea.hbm %s2171_s8, 64 }
 0x192   : > { %943 = vperm.xlu1 %1316, %v1596_v11   ;;  %v838_v37 = vpop.permute.xlu2 %837  ;;  %s1073_s25 = sshll.u32 %s335_s22, 4  ;;  %p1347_p5 = scmp.lt.s32.totalorder %s1345_s11, %s1341_s15  ;;  %s1074_s25 = int_to_ptr.vmem [resolvable:$true] %s1073_s25 }
 0x193   : > { %v871_v28 = vpop.permute.xlu0 %870  ;;  %v781_v29 = vpop.permute.xlu1 %780 }
 0x194   : > { %v789_v34 = vmul.f32 %v781_v29, %v762_v31  ;;  %v790_v53 = vmul.f32 %v781_v29, %v766_v25  ;;  %p1348_p6 = por %p1347_p5, %p1346_p4 }
 0x196   : > { %v797_v55 = vadd.f32 %v789_v34, %v740_v19  ;;  %v798_v21 = vadd.f32 %v790_v53, %v741_v10  ;;  %p1349_p7 = pnand %p1348_p6, %p1344_p2 }
 0x199   : > { %982 = vperm.xlu2 %1320, %v480_v0  }
 0x19a   : > { %1321 = vset.pattern.permute.xlu1 %v1422_v2  ;;  %v869_v17 = vpop.permute.xlu2 %868  ;;  %v483_v2 = vld [vmem:[%s2170_s7] sm:$0xff] }
 0x19b   : > { %v810_v11 = vpop.permute.xlu0 %809  ;;  %987 = vperm.xlu1 %1321, %v481_v43   ;;  %v806_v44 = vpop.permute.xlu1 %805  ;;  %v875_v52 = vsel %vm872_vm8, %v861_v35, %v869_v17 }
 0x19c   : > { %v819_v56 = vsel %vm815_vm7, %v806_v44, %v814_v15  ;;  %v823_v58 = vsel %vm815_vm7, %v814_v15, %v806_v44 }
 0x19d   : > { %v846_v63 = vmul.f32 %v838_v37, %v819_v56  ;;  %v847_v18 = vmul.f32 %v838_v37, %v823_v58 }
 0x19f   : > { %v854_v45 = vadd.f32 %v846_v63, %v797_v55  ;;  %v855_v62 = vadd.f32 %v847_v18, %v798_v21 }
 0x1a1   : > { %972 = vperm.xlu2 %1320, %v478_v16  }
 0x1a2   : > { %v773_v60 = vpop.permute.xlu2 %772 }
 0x1a3   : > { %v2048_v54 = vpop.permute.xlu0 %925  ;;  %1020 = vperm.xlu1 %1321, %v483_v2   ;;  %v834_v42 = vpop.permute.xlu1 %833  ;;  %v785_v32 = vmul.f32 %v773_v60, %v1970_v12  ;;  %v786_v14 = vmul.f32 %v773_v60, %v1975_v6  ;;  %v879_v12 = vsel %vm872_vm8, %v869_v17, %v861_v35 }
 0x1a4   : > { %v844_v22 = vmul.f32 %v834_v42, %v818_v26  ;;  %v845_v9 = vmul.f32 %v834_v42, %v822_v36 }
 0x1a5   : > { %v793_v5 = vadd.f32 %v785_v32, %v1916_v61  ;;  %v794_v23 = vadd.f32 %v786_v14, %v1918_v49 }
 0x1a6   : > { %v852_v1 = vadd.f32 %v844_v22, %v795_v47  ;;  %v853_v3 = vadd.f32 %v845_v9, %v796_v48 }
 0x1aa   : > { %v800_v8 = vpop.permute.xlu2 %799 }
 0x1ab   : > { %v830_v7 = vpop.permute.xlu0 %829  ;;  %v863_v59 = vpop.permute.xlu1 %862 }
 0x1ac   : > { %v876_v24 = vsel %vm872_vm8, %v863_v59, %v871_v28 }
 0x1b2   : > { %v808_v30 = vpop.permute.xlu2 %807 }
 0x1b3   : > { %v769_v13 = vpop.permute.xlu1 %768 }
 0x1b4   : > { %v783_v6 = vmul.f32 %v769_v13, %v1851_v20  ;;  %v784_v19 = vmul.f32 %v769_v13, %v1855_v46  ;;  %v891_v61 = vpop.permute.xlu0 %890  ;;  %v880_v20 = vsel %vm872_vm8, %v871_v28, %v863_v59 }
 0x1b5   : > { %v901_v10 = vmul.f32 %v891_v61, %v875_v52  ;;  %v902_v49 = vmul.f32 %v891_v61, %v879_v12 }
 0x1b6   : > { %v791_v15 = vadd.f32 %v783_v6, %v1839_v40  ;;  %v792_v27 = vadd.f32 %v784_v19, %v1841_v41  ;;  %v816_v40 = vsel %vm815_vm7, %v800_v8, %v808_v30  ;;  %v820_v41 = vsel %vm815_vm7, %v808_v30, %v800_v8 }
 0x1b7   : > { %v2063_v51 = vadd.f32 %v901_v10, %v852_v1  ;;  %v2065_v31 = vadd.f32 %v902_v49, %v853_v3 }
 0x1ba   : > { %v920_v25 = vpop.permute.xlu2 %919 }
 0x1bc   : > { %v895_v35 = vpop.permute.xlu1 %894  ;;  %v865_v18 = vpop.permute.xlu0 %864 }
 0x1bd   : > { %v903_v46 = vmul.f32 %v895_v35, %v876_v24  ;;  %v904_v4 = vmul.f32 %v895_v35, %v880_v20 }
 0x1bf   : > { %v2071_v33 = vadd.f32 %v903_v46, %v854_v45  ;;  %v2073_v39 = vadd.f32 %v904_v4, %v855_v62 }
 0x1c2   : > { %v826_v26 = vpop.permute.xlu2 %825 }
 0x1c3   : > { %v840_v36 = vmul.f32 %v826_v26, %v816_v40  ;;  %v841_v50 = vmul.f32 %v826_v26, %v820_v41 }
 0x1c4   : > { %v802_v57 = vpop.permute.xlu1 %801  ;;  %v887_v16 = vpop.permute.xlu0 %886 }
 0x1c5   : > { %v817_v47 = vsel %vm815_vm7, %v802_v57, %v810_v11  ;;  %v821_v48 = vsel %vm815_vm7, %v810_v11, %v802_v57  ;;  %v848_v28 = vadd.f32 %v840_v36, %v791_v15  ;;  %v849_v29 = vadd.f32 %v841_v50, %v792_v27 }
 0x1c6   : > { %v842_v37 = vmul.f32 %v830_v7, %v817_v47  ;;  %v843_v34 = vmul.f32 %v830_v7, %v821_v48 }
 0x1c8   : > { %v850_v53 = vadd.f32 %v842_v37, %v793_v5  ;;  %v851_v55 = vadd.f32 %v843_v34, %v794_v23 }
 0x1cb   : > { %v952_v0 = vpop.permute.xlu2 %951 }
 0x1cc   : > { %v918_v21 = vpop.permute.xlu1 %917 }
 0x1cd   : > { %v940_v32 = vpop.permute.xlu0 %939  ;;  %v932_v19 = vsel %vm929_vm9, %v918_v21, %v2048_v54  ;;  %v936_v61 = vsel %vm929_vm9, %v2048_v54, %v918_v21 }
 0x1d3   : > { %v859_v44 = vpop.permute.xlu2 %858 }
 0x1d4   : > { %v928_v43 = vpop.permute.xlu1 %927 }
 0x1d5   : > { %v933_v49 = vsel %vm929_vm9, %v920_v25, %v928_v43  ;;  %v937_v15 = vsel %vm929_vm9, %v928_v43, %v920_v25 }
 0x1d6   : > { %v960_v48 = vmul.f32 %v952_v0, %v933_v49  ;;  %v961_v25 = vmul.f32 %v952_v0, %v937_v15 }
 0x1db   : > { %v883_v56 = vpop.permute.xlu2 %882 }
 0x1dc   : > { %v948_v17 = vpop.permute.xlu1 %947 }
 0x1dd   : > { %v958_v27 = vmul.f32 %v948_v17, %v932_v19  ;;  %v959_v24 = vmul.f32 %v948_v17, %v936_v61  ;;  %v968_v17 = vadd.f32 %v960_v48, %v2071_v33 }
 0x1e3   : > { %v916_v63 = vpop.permute.xlu2 %915 }
 0x1e4   : > { %v857_v58 = vpop.permute.xlu1 %856 }
 0x1e5   : > { %v873_v11 = vsel %vm872_vm8, %v857_v58, %v865_v18  ;;  %v877_v42 = vsel %vm872_vm8, %v865_v18, %v857_v58 }
 0x1e6   : > { %v897_v22 = vmul.f32 %v883_v56, %v873_v11  ;;  %v898_v9 = vmul.f32 %v883_v56, %v877_v42  ;;  %v969_v56 = vadd.f32 %v961_v25, %v2073_v39 }
 0x1e7   : > { %v978_v50 = vpop.permute.xlu0 %977 }
 0x1e8   : > { %v906_v8 = vadd.f32 %v898_v9, %v849_v29  ;;  %v905_v13 = vadd.f32 %v897_v22, %v848_v28  ;;  %v966_v28 = vadd.f32 %v958_v27, %v2063_v51  ;;  %v967_v29 = vadd.f32 %v959_v24, %v2065_v31 }
 0x1eb   : > { %v924_v62 = vpop.permute.xlu2 %923 }
 0x1ec   : > { %v867_v45 = vpop.permute.xlu1 %866  ;;  %v931_v20 = vsel %vm929_vm9, %v916_v63, %v924_v62  ;;  %v935_v35 = vsel %vm929_vm9, %v924_v62, %v916_v63 }
 0x1ed   : > { %v874_v1 = vsel %vm872_vm8, %v859_v44, %v867_v45  ;;  %v878_v3 = vsel %vm872_vm8, %v867_v45, %v859_v44 }
 0x1ee   : > { %v899_v30 = vmul.f32 %v887_v16, %v874_v1  ;;  %v900_v52 = vmul.f32 %v887_v16, %v878_v3  ;;  %v482_v1 = vld [vmem:[%s2169_s6] sm:$0xf] }
 0x1f0   : > { %v907_v46 = vadd.f32 %v899_v30, %v850_v53  ;;  %v908_v4 = vadd.f32 %v900_v52, %v851_v55  ;;  %v1324_v30 = vld [vmem:[%s1585_s20 + $0x8] sm:$0xff] }
 0x1f3   : > { %v983_v60 = vpop.permute.xlu2 %982 }
 0x1f4   : > { %v914_v2 = vpop.permute.xlu1 %913  ;;  %v994_v53 = vadd.f32 %v983_v60, %v966_v28  ;;  %v995_v55 = vadd.f32 %v983_v60, %v967_v29 }
 0x1f6   : > { %v1002_v51 = vmax.f32 %v994_v53, 0.0  ;;  %v1003_v62 = vmax.f32 %v995_v55, 0.0 }
 0x1f8   : > { %v1010_v22 = vmin.f32 %v1002_v51, 6.0  ;;  %v1011_v9 = vmin.f32 %v1003_v62, 6.0 }
 0x1fb   : > { %v973_v10 = vpop.permute.xlu2 %972 }
 0x1fc   : > { %v922_v14 = vpop.permute.xlu1 %921 }
 0x1fd   : > { %v930_v5 = vsel %vm929_vm9, %v914_v2, %v922_v14  ;;  %v934_v23 = vsel %vm929_vm9, %v922_v14, %v914_v2 }
 0x1fe   : > { %v954_v7 = vmul.f32 %v940_v32, %v930_v5  ;;  %v955_v59 = vmul.f32 %v940_v32, %v934_v23 }
 0x200   : > { %v963_v12 = vadd.f32 %v955_v59, %v906_v8  ;;  %v962_v6 = vadd.f32 %v954_v7, %v905_v13  ;;  %v1323_v8 = vld [vmem:[%s1585_s20] sm:$0xff] }
 0x202   : > { %v990_v41 = vadd.f32 %v973_v10, %v962_v6  ;;  %v991_v54 = vadd.f32 %v973_v10, %v963_v12 }
 0x204   : > { %v944_v40 = vpop.permute.xlu1 %943  ;;  %v998_v37 = vmax.f32 %v990_v41, 0.0  ;;  %v999_v34 = vmax.f32 %v991_v54, 0.0 }
 0x205   : > { %v956_v26 = vmul.f32 %v944_v40, %v931_v20  ;;  %v957_v36 = vmul.f32 %v944_v40, %v935_v35 }
 0x206   : > { %v1006_v58 = vmin.f32 %v998_v37, 6.0  ;;  %v1007_v63 = vmin.f32 %v999_v34, 6.0 }
 0x207   : > { %v964_v57 = vadd.f32 %v956_v26, %v907_v46  ;;  %v965_v47 = vadd.f32 %v957_v36, %v908_v4 }
 0x209   : > { %v992_v38 = vadd.f32 %v978_v50, %v964_v57  ;;  %v993_v21 = vadd.f32 %v978_v50, %v965_v47 }
 0x20b   : > { %v1000_v43 = vmax.f32 %v992_v38, 0.0  ;;  %v1001_v44 = vmax.f32 %v993_v21, 0.0 }
 0x20d   : > { %v1008_v18 = vmin.f32 %v1000_v43, 6.0  ;;  %v1009_v0 = vmin.f32 %v1001_v44, 6.0  ;;  %v988_v45 = vpop.permute.xlu1 %987 }
 0x20e   : > { %v996_v31 = vadd.f32 %v988_v45, %v968_v17  ;;  %v997_v16 = vadd.f32 %v988_v45, %v969_v56 }
 0x20f   : > { %v1014_v2 = vpack.c.bf16 %v1008_v18, %v1006_v58  ;;  %v1015_v11 = vpack.c.bf16 %v1009_v0, %v1007_v63 }
 0x210   : > { %v1004_v42 = vmax.f32 %v996_v31, 0.0  ;;  %v1005_v60 = vmax.f32 %v997_v16, 0.0 }
 0x212   : > { %v1012_v33 = vmin.f32 %v1004_v42, 6.0  ;;  %v1013_v39 = vmin.f32 %v1005_v60, 6.0 }
 0x214   : > { %v1016_v32 = vpack.c.bf16 %v1012_v33, %v1010_v22  ;;  %v1017_v14 = vpack.c.bf16 %v1013_v39, %v1011_v9 }
 0x215   : > { %v1021_v3 = vpop.permute.xlu1 %1020 }
 0x216   : > { %1033 = vmatpush.bf16.msra.mxu2 %v1016_v32  ;;  %1046 = vmatpush.bf16.msra.mxu3 %v1017_v14 }
 0x21a   : > { %1034 = vmatpush.bf16.msra.mxu2 %v1014_v2  ;;  %1047 = vmatpush.bf16.msra.mxu3 %v1015_v11 }
 0x21d   : > { %1192 = vmatmul.msk.bf16.vlgmr.msra.gmra.mxu2 %vm1023_vm10, %v482_v1  ;;  %1193 = vmatmul.msk.bf16.vlgmr.msra.gmra.mxu3 %vm1023_vm10, %v482_v1 }
 0x2a0   : > { %v1036_v5 = vpop.f32.mrf.mxu2  ;;  %v1049_v23 = vpop.f32.mrf.mxu3 }
 0x2a1   : > { %v1037_v7 = vadd.f32 %v1036_v5, %v1021_v3  ;;  %v1050_v59 = vadd.f32 %v1049_v23, %v1021_v3 }
 0x2a3   : > { %v1053_v13 = vadd.f32 %v1323_v8, %v1037_v7  ;;  %v1054_v52 = vadd.f32 %v1324_v30, %v1050_v59 }
 0x2a5   : > { %1055 = vst [vmem:[%s335_s22] sm:$0xff] %v1053_v13 }
 0x2a6   : > { %1056 = vst [vmem:[%s335_s22 + $0x8] sm:$0xff] %v1054_v52 }
 0x2a7   : > { %1352 = shalt.err (!%p1349_p7)
}
 0x2a8   : > { %1202 = dma.vmem_to_hbm [thread:$0]  (%p1534_p3), %s1074_s25, 256, %s1076_s0, %s1058_s30   ;;  %v1038_v12 = vpop.f32.mrf.mxu2  ;;  %v1051_v6 = vpop.f32.mrf.mxu3 }
 0x2a9 PF: > { %p1208_p9 = scmp.ge.s32.totalorder %s1419_s12, 2  ;;  %s1087_s20 = sand.u32 1, %s1391_s27  }
 0x2aa   : > { %s1088_s21 = scalar_lea.sflag [#allocation3], %s1087_s20 }
 0x2ab   : > { %p1205_p10 = pnand %p1208_p9, %p1543_p8 }
 0x2ad   : > { %p1206_p11 = pneg %p1205_p10 }
 0x2af   : > { %1386 = dma.done.wait (%p1206_p11), %s1088_s21, 256  }
 0x2b0   : > { %1388 = vsyncadd (%p1206_p11), %s1088_s21, 4294967040  ;;  %s21_s12 = sadd.s32 1, %s1419_s12   ;;  %s2182_s9 = sld [smem:[#allocation5_spill]] }
 0x2b1   : > { %p18_p12 = scmp.ge.s32.totalorder %s21_s12, 6   ;;  %s2183_s0 = sld [smem:[#allocation6_spill]] }
 0x2b2   : > { %s2184_s11 = sld [smem:[#allocation7_spill]]  ;;  %s2185_s27 = smov %s1395_s28 }
 0x2b3   : > { %s2186_s28 = smov %s1399_s29  ;;  %s2187_s29 = smov %s1552_s23 }
 0x2b4   : > { %s2188_s30 = smov %s1411_s10  ;;  %20 = sbr.rel (!%p18_p12) target bundleno = 7 (0x7), region = 90 }
 0x2b7   : > { %s2189_s10 = smov %s2183_s0 }
 0x2b9   :  { %1094 = vsyncpa [#allocation3], 1 }
 0x2ba   :  { %1096 = vsyncpa [#allocation3 + $0x1], 1 }

</bundles_post_ra>
